<compile_context>
chip_gen: v7x
topology: tpu7x:2x2x1
jax: 0.10.0
libtpu: 0.0.40
codegen_flags: <defaults>
</compile_context>

<pallas_src>
import functools
import math

import numpy as np
import jax
import jax.numpy as jnp
from jax.experimental import pallas as pl
from jax.experimental.pallas import tpu as pltpu

# ---------------- hyperparameters (small, consistent with the module) ----------------
VOCAB = 32        # vocab_obj.vocab_size
N_USER = 10       # vocab_obj.user_num
N_ITEM = 12       # vocab_obj.item_num
D = 16            # attr_emb_size == user_emb_size == item_emb_size (required by the cat)
HEADS = 2         # attn_head_num
LAYERS = 2        # attn_layer_num
FF = 32           # attn_linear_size
B = 2             # batch
L = 6             # padded attribute sequence length
S = L + 2         # user + item + attrs
LN_EPS = 1e-5
NEG_INF = -1e30

# ---------------- packed-slab row layout ----------------
# bf16 weight slab (width 48 lanes); every block starts on a multiple of 16 rows (bf16 tile).
W_IN_ROW0 = 0                          # LAYERS x [D, 3D]
W_OUT_ROW0 = W_IN_ROW0 + LAYERS * D    # LAYERS x [D, D]
W1_ROW0 = W_OUT_ROW0 + LAYERS * D      # LAYERS x [D, FF]
W2_ROW0 = W1_ROW0 + LAYERS * D         # LAYERS x [FF, D]
WVOC_ROW0 = W2_ROW0 + LAYERS * FF      # [2D, VOCAB]
WSLAB_ROWS = WVOC_ROW0 + 2 * D         # 192
SLAB_W = 3 * D                         # 48

# f32 slab: combined embedding table rows then 8 vector rows per layer.
T_PAD = 64                             # 10 + 12 + 32 = 54 -> pad to 64
VEC_ROW0 = T_PAD
FSLAB_ROWS = VEC_ROW0 + LAYERS * 8     # 80


# =====================================================================================
# Fused Pallas kernel: gather + mask + both encoder layers + logits, one invocation
# =====================================================================================
def _layer_norm(x, w, b):
    mu = jnp.mean(x, axis=-1, keepdims=True)
    var = jnp.mean((x - mu) ** 2, axis=-1, keepdims=True)
    return (x - mu) * jax.lax.rsqrt(var + LN_EPS) * w + b


def fused_attr_network_kernel(attr_len_ref, idx_ref, fslab_ref, wslab_ref, o_ref,
                              *, batch, seq, num_heads, num_layers):
    """Entire _ATTR_NETWORK forward.

    attr_len_ref: [B]            int32 attribute lengths (SMEM scalars)
    idx_ref:      [B*S, 1]       int32 row indices into the combined embedding table
    fslab_ref:    [80, 48]       f32: rows 0..63 combined [user|item|attr_x] table (cols 0..15),
                                 rows 64.. per-layer vectors (b_in,b_out,ln1_w,ln1_b,b1,b2,ln2_w,ln2_b)
    wslab_ref:    [192, 48]      bf16: w_in | w_out | w1 | w2 | wvoc  (see row-offset constants)
    o_ref:        [B, VOCAB]     f32 logits
    """
    BS = batch * seq
    dh = D // num_heads
    scale = 1.0 / math.sqrt(dh)
    bf16 = jnp.bfloat16

    def wmat(r0, nrows, ncols):
        return wslab_ref[r0:r0 + nrows, 0:ncols]          # bf16 [nrows, ncols]

    def vec(layer, j, w):
        r = VEC_ROW0 + layer * 8 + j
        return fslab_ref[r:r + 1, 0:w]                    # f32 [1, w]

    # ---- fused embedding gather + concat: x = onehot(idx) @ combined table (f32, one dot)
    col_t = jax.lax.broadcasted_iota(jnp.int32, (BS, T_PAD), 1)
    onehot = (col_t == idx_ref[...]).astype(jnp.float32)                  # [BS, T_PAD]
    x = jnp.dot(onehot, fslab_ref[0:T_PAD, 0:D],
                preferred_element_type=jnp.float32)                       # [BS, D]

    # ---- additive attention mask: block-diagonal over batch + key padding (built once)
    # TODO(synk): torch sizes the mask with attr_len.max().item() (dynamic); here the static
    # padded width S is used — mathematically equivalent since extra keys are masked.
    row = jax.lax.broadcasted_iota(jnp.int32, (BS, BS), 0)
    col = jax.lax.broadcasted_iota(jnp.int32, (BS, BS), 1)
    valid = None
    for b in range(batch):
        in_row = (row >= b * seq) & (row < (b + 1) * seq)
        in_col = (col >= b * seq) & (col < (b + 1) * seq)
        key_ok = (col - b * seq) < (attr_len_ref[b] + 2)
        blk = in_row & in_col & key_ok
        valid = blk if valid is None else (valid | blk)
    mask_add = jnp.where(valid, 0.0, NEG_INF)                             # f32 [BS, BS]

    for l in range(num_layers):                 # LAYERS=2 -> cheap unrolled Python loop
        # single fused QKV projection per layer: [BS,16] @ [16,48]
        qkv = jnp.dot(x.astype(bf16), wmat(W_IN_ROW0 + l * D, D, 3 * D),
                      preferred_element_type=jnp.float32) + vec(l, 0, 3 * D)   # [BS, 3D]

        ctx_heads = []
        for h in range(num_heads):
            q = qkv[:, h * dh:(h + 1) * dh] * scale                       # [BS, dh]
            k = qkv[:, D + h * dh: D + (h + 1) * dh]
            v = qkv[:, 2 * D + h * dh: 2 * D + (h + 1) * dh]
            # batch-flattened scores; cross-batch blocks are killed by mask_add
            s = jax.lax.dot_general(q.astype(bf16), k.astype(bf16),
                                    (((1,), (1,)), ((), ())),
                                    preferred_element_type=jnp.float32)   # [BS, BS]
            s = s + mask_add
            s = s - jnp.max(s, axis=-1, keepdims=True)
            p = jnp.exp(s)
            p = p * pl.reciprocal(jnp.sum(p, axis=-1, keepdims=True), approx=True)
            ctx_heads.append(jnp.dot(p.astype(bf16), v.astype(bf16),
                                     preferred_element_type=jnp.float32))  # [BS, dh]
        ctx = jnp.concatenate(ctx_heads, axis=-1)                          # [BS, D]

        # one out-projection dot per layer on the head-concatenated context
        attn = jnp.dot(ctx.astype(bf16), wmat(W_OUT_ROW0 + l * D, D, D),
                       preferred_element_type=jnp.float32) + vec(l, 1, D)
        h1 = _layer_norm(x + attn, vec(l, 2, D), vec(l, 3, D))

        f = jnp.maximum(
            jnp.dot(h1.astype(bf16), wmat(W1_ROW0 + l * D, D, FF),
                    preferred_element_type=jnp.float32) + vec(l, 4, FF), 0.0)
        f = jnp.dot(f.astype(bf16), wmat(W2_ROW0 + l * FF, FF, D),
                    preferred_element_type=jnp.float32) + vec(l, 5, D)
        x = _layer_norm(h1 + f, vec(l, 6, D), vec(l, 7, D))

    # ---- logits: single [B, 2D] @ [2D, VOCAB] matmul
    # (positions 0/1 are never padded since attr_len + 2 >= 2, so the torch-side
    #  `attr_attn * ~mask` multiply is dead work for the logits path and is dropped.)
    hid = jnp.concatenate(
        [jnp.concatenate([x[b * seq: b * seq + 1, :],
                          x[b * seq + 1: b * seq + 2, :]], axis=1)
         for b in range(batch)], axis=0)                                   # [B, 2D]
    o_ref[...] = jnp.dot(hid.astype(bf16), wmat(WVOC_ROW0, 2 * D, VOCAB),
                         preferred_element_type=jnp.float32)


# =====================================================================================
# Host-side parameter packing — done ONCE at init (outside the jitted forward)
# =====================================================================================
def pack_params(params):
    def pad_cols(a, width=SLAB_W):
        a = jnp.asarray(a, jnp.float32)
        return jnp.pad(a, ((0, 0), (0, width - a.shape[1])))

    layers = params["layers"]
    blocks = []
    blocks += [pad_cols(lp["w_in"]) for lp in layers]            # [D, 3D]
    blocks += [pad_cols(lp["w_out"]) for lp in layers]           # [D, D]
    blocks += [pad_cols(lp["w1"]) for lp in layers]              # [D, FF]
    blocks += [pad_cols(lp["w2"]) for lp in layers]              # [FF, D]
    blocks += [pad_cols(jnp.concatenate([params["attr_user_emb"].T,
                                         params["attr_item_emb"].T], axis=0))]  # [2D, VOCAB]
    wslab = jnp.concatenate(blocks, axis=0).astype(jnp.bfloat16)
    assert wslab.shape == (WSLAB_ROWS, SLAB_W)

    emb = jnp.zeros((T_PAD, SLAB_W), jnp.float32)
    emb = emb.at[0:N_USER, 0:D].set(params["user_emb"])
    emb = emb.at[N_USER:N_USER + N_ITEM, 0:D].set(params["item_emb"])
    emb = emb.at[N_USER + N_ITEM:N_USER + N_ITEM + VOCAB, 0:D].set(params["attr_emb_x"])
    vrows = []
    for lp in layers:
        for name in ("b_in", "b_out", "ln1_w", "ln1_b", "b1", "b2", "ln2_w", "ln2_b"):
            vrows.append(pad_cols(lp[name]))
    fslab = jnp.concatenate([emb] + vrows, axis=0)
    assert fslab.shape == (FSLAB_ROWS, SLAB_W)
    return {"wslab": wslab, "fslab": fslab}


# =====================================================================================
# Forward wrapper: only a tiny int index build outside; one fused pallas_call
# =====================================================================================
@jax.jit
def attr_network_forward(packed, user_ids, item_ids, attr_ids, attr_len):
    Bq, Lq = attr_ids.shape
    Sq = Lq + 2
    # combined-table row indices for [user | item | attrs] per batch position
    idx = jnp.concatenate(
        [user_ids[:, None].astype(jnp.int32),
         item_ids[:, None].astype(jnp.int32) + N_USER,
         attr_ids.astype(jnp.int32) + (N_USER + N_ITEM)], axis=1).reshape(Bq * Sq, 1)

    kern = functools.partial(fused_attr_network_kernel, batch=Bq, seq=Sq,
                             num_heads=HEADS, num_layers=LAYERS)
    # Single fused grid=() pallas_call; 3 VMEM DMAs + 1 SMEM transfer total.
    return pl.pallas_call(
        kern,
        out_shape=jax.ShapeDtypeStruct((Bq, VOCAB), jnp.float32),
        in_specs=[
            pl.BlockSpec(memory_space=pltpu.MemorySpace.SMEM),   # attr_len scalars
            pl.BlockSpec(memory_space=pltpu.MemorySpace.VMEM),   # gather indices
            pl.BlockSpec(memory_space=pltpu.MemorySpace.VMEM),   # f32 slab (tables + vectors)
            pl.BlockSpec(memory_space=pltpu.MemorySpace.VMEM),   # bf16 weight slab
        ],
        out_specs=pl.BlockSpec(memory_space=pltpu.MemorySpace.VMEM),
    )(attr_len.astype(jnp.int32), idx, packed["fslab"], packed["wslab"])


# =====================================================================================
# Deterministic parameter init (shapes from the module __init__)
# =====================================================================================
def init_params(key):
    initrange = 0.01

    def u(k, shape, a):
        return jax.random.uniform(k, shape, jnp.float32, -a, a)

    ks = jax.random.split(key, 6)
    params = {
        "attr_user_emb": u(ks[0], (VOCAB, D), initrange),
        "attr_item_emb": u(ks[1], (VOCAB, D), initrange),
        "user_emb": u(ks[2], (N_USER, D), initrange),
        "item_emb": u(ks[3], (N_ITEM, D), initrange),
        "attr_emb_x": u(ks[4], (VOCAB, D), initrange),
        "layers": [],
    }
    lkeys = jax.random.split(ks[5], LAYERS)
    bd, bf = 1.0 / math.sqrt(D), 1.0 / math.sqrt(FF)
    for i in range(LAYERS):
        sk = jax.random.split(lkeys[i], 8)
        params["layers"].append({
            # Linear weights stored as [in, out] (torch keeps [out, in]; same math).
            "w_in": u(sk[0], (D, 3 * D), bd),
            "b_in": u(sk[1], (1, 3 * D), bd),
            "w_out": u(sk[2], (D, D), bd),
            "b_out": u(sk[3], (1, D), bd),
            "ln1_w": jnp.ones((1, D), jnp.float32),
            "ln1_b": jnp.zeros((1, D), jnp.float32),
            "w1": u(sk[4], (D, FF), bd),
            "b1": u(sk[5], (1, FF), bd),
            "w2": u(sk[6], (FF, D), bf),
            "b2": u(sk[7], (1, D), bf),
            "ln2_w": jnp.ones((1, D), jnp.float32),
            "ln2_b": jnp.zeros((1, D), jnp.float32),
        })
    return params


# =====================================================================================
# Pure-JAX reference (same math, full f32) for a sanity check
# =====================================================================================
def _ref_layer_norm(x, w, b):
    mu = x.mean(-1, keepdims=True)
    var = ((x - mu) ** 2).mean(-1, keepdims=True)
    return (x - mu) / jnp.sqrt(var + LN_EPS) * w + b


def _ref_encoder_layer(x, pad_mask, lp):
    Bq, Sq, Dm = x.shape
    dh = Dm // HEADS
    qkv = x @ lp["w_in"] + lp["b_in"]
    q, k, v = jnp.split(qkv, 3, axis=-1)
    q = q.reshape(Bq, Sq, HEADS, dh).transpose(0, 2, 1, 3)
    k = k.reshape(Bq, Sq, HEADS, dh).transpose(0, 2, 1, 3)
    v = v.reshape(Bq, Sq, HEADS, dh).transpose(0, 2, 1, 3)
    s = jnp.einsum("bhqd,bhkd->bhqk", q, k) / math.sqrt(dh)
    s = s + pad_mask[:, None, None, :].astype(jnp.float32) * NEG_INF
    p = jax.nn.softmax(s, axis=-1)
    ctx = jnp.einsum("bhqk,bhkd->bhqd", p, v).transpose(0, 2, 1, 3).reshape(Bq, Sq, Dm)
    attn = ctx @ lp["w_out"] + lp["b_out"]
    h1 = _ref_layer_norm(x + attn, lp["ln1_w"], lp["ln1_b"])
    f = jnp.maximum(h1 @ lp["w1"] + lp["b1"], 0.0) @ lp["w2"] + lp["b2"]
    return _ref_layer_norm(h1 + f, lp["ln2_w"], lp["ln2_b"])


def ref_forward(params, user_ids, item_ids, attr_ids, attr_len):
    ue = params["user_emb"][user_ids]
    ie = params["item_emb"][item_ids]
    ae = params["attr_emb_x"][attr_ids]
    attr_len2 = attr_len + 2
    Sq = attr_ids.shape[1] + 2
    pad_mask = jnp.arange(Sq)[None, :] >= attr_len2[:, None]
    x = jnp.concatenate([ue[:, None, :], ie[:, None, :], ae], axis=1)
    for lp in params["layers"]:
        x = _ref_encoder_layer(x, pad_mask, lp)
    x = x * (~pad_mask)[..., None].astype(jnp.float32)
    uh, ih = x[:, 0], x[:, 1]
    return uh @ params["attr_user_emb"].T + ih @ params["attr_item_emb"].T


# =====================================================================================
if __name__ == "__main__":
    key = jax.random.PRNGKey(0)
    pkey, ukey, ikey, akey = jax.random.split(key, 4)

    params = init_params(pkey)
    packed = pack_params(params)        # packed ONCE, outside the jitted forward

    user_ids = jax.random.randint(ukey, (B,), 0, N_USER)
    item_ids = jax.random.randint(ikey, (B,), 0, N_ITEM)
    attr_ids = jax.random.randint(akey, (B, L), 0, VOCAB)
    attr_len = jnp.array([L, 3], dtype=jnp.int32)   # max length == L, matching the padding

    logits = attr_network_forward(packed, user_ids, item_ids, attr_ids, attr_len)
    logits = jax.block_until_ready(logits)

    ref = ref_forward(params, user_ids, item_ids, attr_ids, attr_len)
    np.testing.assert_allclose(np.asarray(logits), np.asarray(ref), rtol=2e-2, atol=2e-2)

    print("KERNEL_OK")
</pallas_src>

<mosaic_0001>
module attributes {stable_mosaic.version = 11 : i64} {
  func.func @fused_attr_network_kernel(%arg0: memref<2xi32, #tpu.memory_space<smem>>, %arg1: memref<16x1xi32, #tpu.memory_space<vmem>>, %arg2: memref<80x48xf32, #tpu.memory_space<vmem>>, %arg3: memref<192x48xbf16, #tpu.memory_space<vmem>>, %arg4: memref<2x32xf32, #tpu.memory_space<vmem>>) attributes {dimension_semantics = [], scalar_prefetch = 0 : i64, scratch_operands = 0 : i64, tpu.core_type = #tpu.core_type<tc>} {
    %0 = tpu.iota {dimensions = array<i32: 1>} : vector<16x64xi32>
    %c0 = arith.constant 0 : index
    %c0_0 = arith.constant 0 : index
    %1 = vector.load %arg1[%c0, %c0_0] : memref<16x1xi32, #tpu.memory_space<vmem>>, vector<16x1xi32>
    %2 = vector.broadcast %1 : vector<16x1xi32> to vector<16x64xi32>
    %3 = arith.cmpi eq, %0, %2 : vector<16x64xi32>
    %4 = arith.extui %3 : vector<16x64xi1> to vector<16x64xi32>
    %5 = arith.sitofp %4 : vector<16x64xi32> to vector<16x64xf32>
    %c0_1 = arith.constant 0 : index
    %c0_2 = arith.constant 0 : index
    %6 = vector.load %arg2[%c0_1, %c0_2] : memref<80x48xf32, #tpu.memory_space<vmem>>, vector<64x16xf32>
    %cst = arith.constant dense<0.000000e+00> : vector<16x16xf32>
    %7 = tpu.matmul %5, %6, %cst {dimension_numbers = #tpu.dot_dimension_numbers<[1], [0], [0], [1], [0, 0, 1, 1], [], []>} : vector<16x64xf32>, vector<64x16xf32>, vector<16x16xf32> -> vector<16x16xf32>
    %8 = tpu.iota {dimensions = array<i32: 0>} : vector<16x16xi32>
    %9 = tpu.iota {dimensions = array<i32: 1>} : vector<16x16xi32>
    %c0_i32 = arith.constant 0 : i32
    %10 = vector.broadcast %c0_i32 : i32 to vector<16x16xi32>
    %11 = arith.cmpi sge, %8, %10 : vector<16x16xi32>
    %c8_i32 = arith.constant 8 : i32
    %12 = vector.broadcast %c8_i32 : i32 to vector<16x16xi32>
    %13 = arith.cmpi slt, %8, %12 : vector<16x16xi32>
    %14 = arith.andi %11, %13 : vector<16x16xi1>
    %c0_i32_3 = arith.constant 0 : i32
    %15 = vector.broadcast %c0_i32_3 : i32 to vector<16x16xi32>
    %16 = arith.cmpi sge, %9, %15 : vector<16x16xi32>
    %c8_i32_4 = arith.constant 8 : i32
    %17 = vector.broadcast %c8_i32_4 : i32 to vector<16x16xi32>
    %18 = arith.cmpi slt, %9, %17 : vector<16x16xi32>
    %19 = arith.andi %16, %18 : vector<16x16xi1>
    %c0_i32_5 = arith.constant 0 : i32
    %20 = vector.broadcast %c0_i32_5 : i32 to vector<16x16xi32>
    %21 = arith.subi %9, %20 : vector<16x16xi32>
    %c0_6 = arith.constant 0 : index
    %22 = memref.load %arg0[%c0_6] : memref<2xi32, #tpu.memory_space<smem>>
    %c2_i32 = arith.constant 2 : i32
    %23 = arith.addi %22, %c2_i32 : i32
    %24 = vector.broadcast %23 : i32 to vector<16x16xi32>
    %25 = arith.cmpi slt, %21, %24 : vector<16x16xi32>
    %26 = arith.andi %14, %19 : vector<16x16xi1>
    %27 = arith.andi %26, %25 : vector<16x16xi1>
    %c8_i32_7 = arith.constant 8 : i32
    %28 = vector.broadcast %c8_i32_7 : i32 to vector<16x16xi32>
    %29 = arith.cmpi sge, %8, %28 : vector<16x16xi32>
    %c16_i32 = arith.constant 16 : i32
    %30 = vector.broadcast %c16_i32 : i32 to vector<16x16xi32>
    %31 = arith.cmpi slt, %8, %30 : vector<16x16xi32>
    %32 = arith.andi %29, %31 : vector<16x16xi1>
    %c8_i32_8 = arith.constant 8 : i32
    %33 = vector.broadcast %c8_i32_8 : i32 to vector<16x16xi32>
    %34 = arith.cmpi sge, %9, %33 : vector<16x16xi32>
    %c16_i32_9 = arith.constant 16 : i32
    %35 = vector.broadcast %c16_i32_9 : i32 to vector<16x16xi32>
    %36 = arith.cmpi slt, %9, %35 : vector<16x16xi32>
    %37 = arith.andi %34, %36 : vector<16x16xi1>
    %c8_i32_10 = arith.constant 8 : i32
    %38 = vector.broadcast %c8_i32_10 : i32 to vector<16x16xi32>
    %39 = arith.subi %9, %38 : vector<16x16xi32>
    %c1 = arith.constant 1 : index
    %40 = memref.load %arg0[%c1] : memref<2xi32, #tpu.memory_space<smem>>
    %c2_i32_11 = arith.constant 2 : i32
    %41 = arith.addi %40, %c2_i32_11 : i32
    %42 = vector.broadcast %41 : i32 to vector<16x16xi32>
    %43 = arith.cmpi slt, %39, %42 : vector<16x16xi32>
    %44 = arith.andi %32, %37 : vector<16x16xi1>
    %45 = arith.andi %44, %43 : vector<16x16xi1>
    %46 = arith.ori %27, %45 : vector<16x16xi1>
    %cst_12 = arith.constant 0.000000e+00 : f32
    %cst_13 = arith.constant -1.000000e+30 : f32
    %47 = vector.broadcast %cst_12 : f32 to vector<16x16xf32>
    %48 = vector.broadcast %cst_13 : f32 to vector<16x16xf32>
    %49 = arith.select %46, %47, %48 : vector<16x16xi1>, vector<16x16xf32>
    %50 = arith.truncf %7 : vector<16x16xf32> to vector<16x16xbf16>
    %c0_14 = arith.constant 0 : index
    %c0_15 = arith.constant 0 : index
    %51 = vector.load %arg3[%c0_14, %c0_15] : memref<192x48xbf16, #tpu.memory_space<vmem>>, vector<16x48xbf16>
    %cst_16 = arith.constant dense<0.000000e+00> : vector<16x48xf32>
    %52 = tpu.matmul %50, %51, %cst_16 {dimension_numbers = #tpu.dot_dimension_numbers<[1], [0], [0], [1], [0, 0, 1, 1], [], []>} : vector<16x16xbf16>, vector<16x48xbf16>, vector<16x48xf32> -> vector<16x48xf32>
    %c64 = arith.constant 64 : index
    %c0_17 = arith.constant 0 : index
    %53 = vector.load %arg2[%c64, %c0_17] : memref<80x48xf32, #tpu.memory_space<vmem>>, vector<1x48xf32>
    %54 = vector.broadcast %53 : vector<1x48xf32> to vector<16x48xf32>
    %55 = arith.addf %52, %54 : vector<16x48xf32>
    %56 = vector.extract_strided_slice %55 {offsets = [0, 0], sizes = [16, 8], strides = [1, 1]} : vector<16x48xf32> to vector<16x8xf32>
    %cst_18 = arith.constant 0.353553385 : f32
    %57 = vector.broadcast %cst_18 : f32 to vector<16x8xf32>
    %58 = arith.mulf %56, %57 : vector<16x8xf32>
    %59 = vector.extract_strided_slice %55 {offsets = [0, 16], sizes = [16, 8], strides = [1, 1]} : vector<16x48xf32> to vector<16x8xf32>
    %60 = vector.extract_strided_slice %55 {offsets = [0, 32], sizes = [16, 8], strides = [1, 1]} : vector<16x48xf32> to vector<16x8xf32>
    %61 = arith.truncf %58 : vector<16x8xf32> to vector<16x8xbf16>
    %62 = arith.truncf %59 : vector<16x8xf32> to vector<16x8xbf16>
    %cst_19 = arith.constant dense<0.000000e+00> : vector<16x16xf32>
    %63 = tpu.matmul %61, %62, %cst_19 {dimension_numbers = #tpu.dot_dimension_numbers<[1], [1], [0], [0], [0, 0, 1, 0], [], []>} : vector<16x8xbf16>, vector<16x8xbf16>, vector<16x16xf32> -> vector<16x16xf32>
    %64 = arith.addf %63, %49 : vector<16x16xf32>
    %cst_20 = arith.constant dense<0xFF800000> : vector<16xf32>
    %65 = vector.multi_reduction <maximumf>, %64, %cst_20 [1] : vector<16x16xf32> to vector<16xf32>
    %66 = vector.shape_cast %65 : vector<16xf32> to vector<16x1xf32>
    %67 = vector.broadcast %66 : vector<16x1xf32> to vector<16x16xf32>
    %68 = arith.subf %64, %67 : vector<16x16xf32>
    %69 = math.exp %68 : vector<16x16xf32>
    %cst_21 = arith.constant dense<0.000000e+00> : vector<16xf32>
    %70 = vector.multi_reduction <add>, %69, %cst_21 [1] : vector<16x16xf32> to vector<16xf32>
    %71 = vector.shape_cast %70 : vector<16xf32> to vector<16x1xf32>
    %72 = tpu.reciprocal %71 {approx = true} : vector<16x1xf32> -> vector<16x1xf32>
    %73 = vector.broadcast %72 : vector<16x1xf32> to vector<16x16xf32>
    %74 = arith.mulf %69, %73 : vector<16x16xf32>
    %75 = arith.truncf %74 : vector<16x16xf32> to vector<16x16xbf16>
    %76 = arith.truncf %60 : vector<16x8xf32> to vector<16x8xbf16>
    %cst_22 = arith.constant dense<0.000000e+00> : vector<16x8xf32>
    %77 = tpu.matmul %75, %76, %cst_22 {dimension_numbers = #tpu.dot_dimension_numbers<[1], [0], [0], [1], [0, 0, 1, 1], [], []>} : vector<16x16xbf16>, vector<16x8xbf16>, vector<16x8xf32> -> vector<16x8xf32>
    %78 = vector.extract_strided_slice %55 {offsets = [0, 8], sizes = [16, 8], strides = [1, 1]} : vector<16x48xf32> to vector<16x8xf32>
    %cst_23 = arith.constant 0.353553385 : f32
    %79 = vector.broadcast %cst_23 : f32 to vector<16x8xf32>
    %80 = arith.mulf %78, %79 : vector<16x8xf32>
    %81 = vector.extract_strided_slice %55 {offsets = [0, 24], sizes = [16, 8], strides = [1, 1]} : vector<16x48xf32> to vector<16x8xf32>
    %82 = vector.extract_strided_slice %55 {offsets = [0, 40], sizes = [16, 8], strides = [1, 1]} : vector<16x48xf32> to vector<16x8xf32>
    %83 = arith.truncf %80 : vector<16x8xf32> to vector<16x8xbf16>
    %84 = arith.truncf %81 : vector<16x8xf32> to vector<16x8xbf16>
    %cst_24 = arith.constant dense<0.000000e+00> : vector<16x16xf32>
    %85 = tpu.matmul %83, %84, %cst_24 {dimension_numbers = #tpu.dot_dimension_numbers<[1], [1], [0], [0], [0, 0, 1, 0], [], []>} : vector<16x8xbf16>, vector<16x8xbf16>, vector<16x16xf32> -> vector<16x16xf32>
    %86 = arith.addf %85, %49 : vector<16x16xf32>
    %cst_25 = arith.constant dense<0xFF800000> : vector<16xf32>
    %87 = vector.multi_reduction <maximumf>, %86, %cst_25 [1] : vector<16x16xf32> to vector<16xf32>
    %88 = vector.shape_cast %87 : vector<16xf32> to vector<16x1xf32>
    %89 = vector.broadcast %88 : vector<16x1xf32> to vector<16x16xf32>
    %90 = arith.subf %86, %89 : vector<16x16xf32>
    %91 = math.exp %90 : vector<16x16xf32>
    %cst_26 = arith.constant dense<0.000000e+00> : vector<16xf32>
    %92 = vector.multi_reduction <add>, %91, %cst_26 [1] : vector<16x16xf32> to vector<16xf32>
    %93 = vector.shape_cast %92 : vector<16xf32> to vector<16x1xf32>
    %94 = tpu.reciprocal %93 {approx = true} : vector<16x1xf32> -> vector<16x1xf32>
    %95 = vector.broadcast %94 : vector<16x1xf32> to vector<16x16xf32>
    %96 = arith.mulf %91, %95 : vector<16x16xf32>
    %97 = arith.truncf %96 : vector<16x16xf32> to vector<16x16xbf16>
    %98 = arith.truncf %82 : vector<16x8xf32> to vector<16x8xbf16>
    %cst_27 = arith.constant dense<0.000000e+00> : vector<16x8xf32>
    %99 = tpu.matmul %97, %98, %cst_27 {dimension_numbers = #tpu.dot_dimension_numbers<[1], [0], [0], [1], [0, 0, 1, 1], [], []>} : vector<16x16xbf16>, vector<16x8xbf16>, vector<16x8xf32> -> vector<16x8xf32>
    %100 = tpu.concatenate %77, %99 in 1 : vector<16x8xf32>, vector<16x8xf32> -> vector<16x16xf32>
    %101 = arith.truncf %100 : vector<16x16xf32> to vector<16x16xbf16>
    %c32 = arith.constant 32 : index
    %c0_28 = arith.constant 0 : index
    %102 = vector.load %arg3[%c32, %c0_28] : memref<192x48xbf16, #tpu.memory_space<vmem>>, vector<16x16xbf16>
    %cst_29 = arith.constant dense<0.000000e+00> : vector<16x16xf32>
    %103 = tpu.matmul %101, %102, %cst_29 {dimension_numbers = #tpu.dot_dimension_numbers<[1], [0], [0], [1], [0, 0, 1, 1], [], []>} : vector<16x16xbf16>, vector<16x16xbf16>, vector<16x16xf32> -> vector<16x16xf32>
    %c65 = arith.constant 65 : index
    %c0_30 = arith.constant 0 : index
    %104 = vector.load %arg2[%c65, %c0_30] : memref<80x48xf32, #tpu.memory_space<vmem>>, vector<1x16xf32>
    %105 = vector.broadcast %104 : vector<1x16xf32> to vector<16x16xf32>
    %106 = arith.addf %103, %105 : vector<16x16xf32>
    %107 = arith.addf %7, %106 : vector<16x16xf32>
    %c66 = arith.constant 66 : index
    %c0_31 = arith.constant 0 : index
    %108 = vector.load %arg2[%c66, %c0_31] : memref<80x48xf32, #tpu.memory_space<vmem>>, vector<1x16xf32>
    %c67 = arith.constant 67 : index
    %c0_32 = arith.constant 0 : index
    %109 = vector.load %arg2[%c67, %c0_32] : memref<80x48xf32, #tpu.memory_space<vmem>>, vector<1x16xf32>
    %cst_33 = arith.constant dense<0.000000e+00> : vector<16xf32>
    %110 = vector.multi_reduction <add>, %107, %cst_33 [1] : vector<16x16xf32> to vector<16xf32>
    %111 = vector.shape_cast %110 : vector<16xf32> to vector<16x1xf32>
    %cst_34 = arith.constant 1.600000e+01 : f32
    %112 = vector.broadcast %cst_34 : f32 to vector<16x1xf32>
    %113 = arith.divf %111, %112 : vector<16x1xf32>
    %114 = vector.broadcast %113 : vector<16x1xf32> to vector<16x16xf32>
    %115 = arith.subf %107, %114 : vector<16x16xf32>
    %116 = arith.mulf %115, %115 : vector<16x16xf32>
    %cst_35 = arith.constant dense<0.000000e+00> : vector<16xf32>
    %117 = vector.multi_reduction <add>, %116, %cst_35 [1] : vector<16x16xf32> to vector<16xf32>
    %118 = vector.shape_cast %117 : vector<16xf32> to vector<16x1xf32>
    %cst_36 = arith.constant 1.600000e+01 : f32
    %119 = vector.broadcast %cst_36 : f32 to vector<16x1xf32>
    %120 = arith.divf %118, %119 : vector<16x1xf32>
    %121 = vector.broadcast %113 : vector<16x1xf32> to vector<16x16xf32>
    %122 = arith.subf %107, %121 : vector<16x16xf32>
    %cst_37 = arith.constant 9.99999974E-6 : f32
    %123 = vector.broadcast %cst_37 : f32 to vector<16x1xf32>
    %124 = arith.addf %120, %123 : vector<16x1xf32>
    %125 = math.rsqrt %124 : vector<16x1xf32>
    %126 = vector.broadcast %125 : vector<16x1xf32> to vector<16x16xf32>
    %127 = arith.mulf %122, %126 : vector<16x16xf32>
    %128 = vector.broadcast %108 : vector<1x16xf32> to vector<16x16xf32>
    %129 = arith.mulf %127, %128 : vector<16x16xf32>
    %130 = vector.broadcast %109 : vector<1x16xf32> to vector<16x16xf32>
    %131 = arith.addf %129, %130 : vector<16x16xf32>
    %132 = arith.truncf %131 : vector<16x16xf32> to vector<16x16xbf16>
    %c64_38 = arith.constant 64 : index
    %c0_39 = arith.constant 0 : index
    %133 = vector.load %arg3[%c64_38, %c0_39] : memref<192x48xbf16, #tpu.memory_space<vmem>>, vector<16x32xbf16>
    %cst_40 = arith.constant dense<0.000000e+00> : vector<16x32xf32>
    %134 = tpu.matmul %132, %133, %cst_40 {dimension_numbers = #tpu.dot_dimension_numbers<[1], [0], [0], [1], [0, 0, 1, 1], [], []>} : vector<16x16xbf16>, vector<16x32xbf16>, vector<16x32xf32> -> vector<16x32xf32>
    %c68 = arith.constant 68 : index
    %c0_41 = arith.constant 0 : index
    %135 = vector.load %arg2[%c68, %c0_41] : memref<80x48xf32, #tpu.memory_space<vmem>>, vector<1x32xf32>
    %136 = vector.broadcast %135 : vector<1x32xf32> to vector<16x32xf32>
    %137 = arith.addf %134, %136 : vector<16x32xf32>
    %cst_42 = arith.constant 0.000000e+00 : f32
    %138 = vector.broadcast %cst_42 : f32 to vector<16x32xf32>
    %139 = arith.maximumf %137, %138 : vector<16x32xf32>
    %140 = arith.truncf %139 : vector<16x32xf32> to vector<16x32xbf16>
    %c96 = arith.constant 96 : index
    %c0_43 = arith.constant 0 : index
    %141 = vector.load %arg3[%c96, %c0_43] : memref<192x48xbf16, #tpu.memory_space<vmem>>, vector<32x16xbf16>
    %cst_44 = arith.constant dense<0.000000e+00> : vector<16x16xf32>
    %142 = tpu.matmul %140, %141, %cst_44 {dimension_numbers = #tpu.dot_dimension_numbers<[1], [0], [0], [1], [0, 0, 1, 1], [], []>} : vector<16x32xbf16>, vector<32x16xbf16>, vector<16x16xf32> -> vector<16x16xf32>
    %c69 = arith.constant 69 : index
    %c0_45 = arith.constant 0 : index
    %143 = vector.load %arg2[%c69, %c0_45] : memref<80x48xf32, #tpu.memory_space<vmem>>, vector<1x16xf32>
    %144 = vector.broadcast %143 : vector<1x16xf32> to vector<16x16xf32>
    %145 = arith.addf %142, %144 : vector<16x16xf32>
    %146 = arith.addf %131, %145 : vector<16x16xf32>
    %c70 = arith.constant 70 : index
    %c0_46 = arith.constant 0 : index
    %147 = vector.load %arg2[%c70, %c0_46] : memref<80x48xf32, #tpu.memory_space<vmem>>, vector<1x16xf32>
    %c71 = arith.constant 71 : index
    %c0_47 = arith.constant 0 : index
    %148 = vector.load %arg2[%c71, %c0_47] : memref<80x48xf32, #tpu.memory_space<vmem>>, vector<1x16xf32>
    %cst_48 = arith.constant dense<0.000000e+00> : vector<16xf32>
    %149 = vector.multi_reduction <add>, %146, %cst_48 [1] : vector<16x16xf32> to vector<16xf32>
    %150 = vector.shape_cast %149 : vector<16xf32> to vector<16x1xf32>
    %cst_49 = arith.constant 1.600000e+01 : f32
    %151 = vector.broadcast %cst_49 : f32 to vector<16x1xf32>
    %152 = arith.divf %150, %151 : vector<16x1xf32>
    %153 = vector.broadcast %152 : vector<16x1xf32> to vector<16x16xf32>
    %154 = arith.subf %146, %153 : vector<16x16xf32>
    %155 = arith.mulf %154, %154 : vector<16x16xf32>
    %cst_50 = arith.constant dense<0.000000e+00> : vector<16xf32>
    %156 = vector.multi_reduction <add>, %155, %cst_50 [1] : vector<16x16xf32> to vector<16xf32>
    %157 = vector.shape_cast %156 : vector<16xf32> to vector<16x1xf32>
    %cst_51 = arith.constant 1.600000e+01 : f32
    %158 = vector.broadcast %cst_51 : f32 to vector<16x1xf32>
    %159 = arith.divf %157, %158 : vector<16x1xf32>
    %160 = vector.broadcast %152 : vector<16x1xf32> to vector<16x16xf32>
    %161 = arith.subf %146, %160 : vector<16x16xf32>
    %cst_52 = arith.constant 9.99999974E-6 : f32
    %162 = vector.broadcast %cst_52 : f32 to vector<16x1xf32>
    %163 = arith.addf %159, %162 : vector<16x1xf32>
    %164 = math.rsqrt %163 : vector<16x1xf32>
    %165 = vector.broadcast %164 : vector<16x1xf32> to vector<16x16xf32>
    %166 = arith.mulf %161, %165 : vector<16x16xf32>
    %167 = vector.broadcast %147 : vector<1x16xf32> to vector<16x16xf32>
    %168 = arith.mulf %166, %167 : vector<16x16xf32>
    %169 = vector.broadcast %148 : vector<1x16xf32> to vector<16x16xf32>
    %170 = arith.addf %168, %169 : vector<16x16xf32>
    %171 = arith.truncf %170 : vector<16x16xf32> to vector<16x16xbf16>
    %c16 = arith.constant 16 : index
    %c0_53 = arith.constant 0 : index
    %172 = vector.load %arg3[%c16, %c0_53] : memref<192x48xbf16, #tpu.memory_space<vmem>>, vector<16x48xbf16>
    %cst_54 = arith.constant dense<0.000000e+00> : vector<16x48xf32>
    %173 = tpu.matmul %171, %172, %cst_54 {dimension_numbers = #tpu.dot_dimension_numbers<[1], [0], [0], [1], [0, 0, 1, 1], [], []>} : vector<16x16xbf16>, vector<16x48xbf16>, vector<16x48xf32> -> vector<16x48xf32>
    %c72 = arith.constant 72 : index
    %c0_55 = arith.constant 0 : index
    %174 = vector.load %arg2[%c72, %c0_55] : memref<80x48xf32, #tpu.memory_space<vmem>>, vector<1x48xf32>
    %175 = vector.broadcast %174 : vector<1x48xf32> to vector<16x48xf32>
    %176 = arith.addf %173, %175 : vector<16x48xf32>
    %177 = vector.extract_strided_slice %176 {offsets = [0, 0], sizes = [16, 8], strides = [1, 1]} : vector<16x48xf32> to vector<16x8xf32>
    %cst_56 = arith.constant 0.353553385 : f32
    %178 = vector.broadcast %cst_56 : f32 to vector<16x8xf32>
    %179 = arith.mulf %177, %178 : vector<16x8xf32>
    %180 = vector.extract_strided_slice %176 {offsets = [0, 16], sizes = [16, 8], strides = [1, 1]} : vector<16x48xf32> to vector<16x8xf32>
    %181 = vector.extract_strided_slice %176 {offsets = [0, 32], sizes = [16, 8], strides = [1, 1]} : vector<16x48xf32> to vector<16x8xf32>
    %182 = arith.truncf %179 : vector<16x8xf32> to vector<16x8xbf16>
    %183 = arith.truncf %180 : vector<16x8xf32> to vector<16x8xbf16>
    %cst_57 = arith.constant dense<0.000000e+00> : vector<16x16xf32>
    %184 = tpu.matmul %182, %183, %cst_57 {dimension_numbers = #tpu.dot_dimension_numbers<[1], [1], [0], [0], [0, 0, 1, 0], [], []>} : vector<16x8xbf16>, vector<16x8xbf16>, vector<16x16xf32> -> vector<16x16xf32>
    %185 = arith.addf %184, %49 : vector<16x16xf32>
    %cst_58 = arith.constant dense<0xFF800000> : vector<16xf32>
    %186 = vector.multi_reduction <maximumf>, %185, %cst_58 [1] : vector<16x16xf32> to vector<16xf32>
    %187 = vector.shape_cast %186 : vector<16xf32> to vector<16x1xf32>
    %188 = vector.broadcast %187 : vector<16x1xf32> to vector<16x16xf32>
    %189 = arith.subf %185, %188 : vector<16x16xf32>
    %190 = math.exp %189 : vector<16x16xf32>
    %cst_59 = arith.constant dense<0.000000e+00> : vector<16xf32>
    %191 = vector.multi_reduction <add>, %190, %cst_59 [1] : vector<16x16xf32> to vector<16xf32>
    %192 = vector.shape_cast %191 : vector<16xf32> to vector<16x1xf32>
    %193 = tpu.reciprocal %192 {approx = true} : vector<16x1xf32> -> vector<16x1xf32>
    %194 = vector.broadcast %193 : vector<16x1xf32> to vector<16x16xf32>
    %195 = arith.mulf %190, %194 : vector<16x16xf32>
    %196 = arith.truncf %195 : vector<16x16xf32> to vector<16x16xbf16>
    %197 = arith.truncf %181 : vector<16x8xf32> to vector<16x8xbf16>
    %cst_60 = arith.constant dense<0.000000e+00> : vector<16x8xf32>
    %198 = tpu.matmul %196, %197, %cst_60 {dimension_numbers = #tpu.dot_dimension_numbers<[1], [0], [0], [1], [0, 0, 1, 1], [], []>} : vector<16x16xbf16>, vector<16x8xbf16>, vector<16x8xf32> -> vector<16x8xf32>
    %199 = vector.extract_strided_slice %176 {offsets = [0, 8], sizes = [16, 8], strides = [1, 1]} : vector<16x48xf32> to vector<16x8xf32>
    %cst_61 = arith.constant 0.353553385 : f32
    %200 = vector.broadcast %cst_61 : f32 to vector<16x8xf32>
    %201 = arith.mulf %199, %200 : vector<16x8xf32>
    %202 = vector.extract_strided_slice %176 {offsets = [0, 24], sizes = [16, 8], strides = [1, 1]} : vector<16x48xf32> to vector<16x8xf32>
    %203 = vector.extract_strided_slice %176 {offsets = [0, 40], sizes = [16, 8], strides = [1, 1]} : vector<16x48xf32> to vector<16x8xf32>
    %204 = arith.truncf %201 : vector<16x8xf32> to vector<16x8xbf16>
    %205 = arith.truncf %202 : vector<16x8xf32> to vector<16x8xbf16>
    %cst_62 = arith.constant dense<0.000000e+00> : vector<16x16xf32>
    %206 = tpu.matmul %204, %205, %cst_62 {dimension_numbers = #tpu.dot_dimension_numbers<[1], [1], [0], [0], [0, 0, 1, 0], [], []>} : vector<16x8xbf16>, vector<16x8xbf16>, vector<16x16xf32> -> vector<16x16xf32>
    %207 = arith.addf %206, %49 : vector<16x16xf32>
    %cst_63 = arith.constant dense<0xFF800000> : vector<16xf32>
    %208 = vector.multi_reduction <maximumf>, %207, %cst_63 [1] : vector<16x16xf32> to vector<16xf32>
    %209 = vector.shape_cast %208 : vector<16xf32> to vector<16x1xf32>
    %210 = vector.broadcast %209 : vector<16x1xf32> to vector<16x16xf32>
    %211 = arith.subf %207, %210 : vector<16x16xf32>
    %212 = math.exp %211 : vector<16x16xf32>
    %cst_64 = arith.constant dense<0.000000e+00> : vector<16xf32>
    %213 = vector.multi_reduction <add>, %212, %cst_64 [1] : vector<16x16xf32> to vector<16xf32>
    %214 = vector.shape_cast %213 : vector<16xf32> to vector<16x1xf32>
    %215 = tpu.reciprocal %214 {approx = true} : vector<16x1xf32> -> vector<16x1xf32>
    %216 = vector.broadcast %215 : vector<16x1xf32> to vector<16x16xf32>
    %217 = arith.mulf %212, %216 : vector<16x16xf32>
    %218 = arith.truncf %217 : vector<16x16xf32> to vector<16x16xbf16>
    %219 = arith.truncf %203 : vector<16x8xf32> to vector<16x8xbf16>
    %cst_65 = arith.constant dense<0.000000e+00> : vector<16x8xf32>
    %220 = tpu.matmul %218, %219, %cst_65 {dimension_numbers = #tpu.dot_dimension_numbers<[1], [0], [0], [1], [0, 0, 1, 1], [], []>} : vector<16x16xbf16>, vector<16x8xbf16>, vector<16x8xf32> -> vector<16x8xf32>
    %221 = tpu.concatenate %198, %220 in 1 : vector<16x8xf32>, vector<16x8xf32> -> vector<16x16xf32>
    %222 = arith.truncf %221 : vector<16x16xf32> to vector<16x16xbf16>
    %c48 = arith.constant 48 : index
    %c0_66 = arith.constant 0 : index
    %223 = vector.load %arg3[%c48, %c0_66] : memref<192x48xbf16, #tpu.memory_space<vmem>>, vector<16x16xbf16>
    %cst_67 = arith.constant dense<0.000000e+00> : vector<16x16xf32>
    %224 = tpu.matmul %222, %223, %cst_67 {dimension_numbers = #tpu.dot_dimension_numbers<[1], [0], [0], [1], [0, 0, 1, 1], [], []>} : vector<16x16xbf16>, vector<16x16xbf16>, vector<16x16xf32> -> vector<16x16xf32>
    %c73 = arith.constant 73 : index
    %c0_68 = arith.constant 0 : index
    %225 = vector.load %arg2[%c73, %c0_68] : memref<80x48xf32, #tpu.memory_space<vmem>>, vector<1x16xf32>
    %226 = vector.broadcast %225 : vector<1x16xf32> to vector<16x16xf32>
    %227 = arith.addf %224, %226 : vector<16x16xf32>
    %228 = arith.addf %170, %227 : vector<16x16xf32>
    %c74 = arith.constant 74 : index
    %c0_69 = arith.constant 0 : index
    %229 = vector.load %arg2[%c74, %c0_69] : memref<80x48xf32, #tpu.memory_space<vmem>>, vector<1x16xf32>
    %c75 = arith.constant 75 : index
    %c0_70 = arith.constant 0 : index
    %230 = vector.load %arg2[%c75, %c0_70] : memref<80x48xf32, #tpu.memory_space<vmem>>, vector<1x16xf32>
    %cst_71 = arith.constant dense<0.000000e+00> : vector<16xf32>
    %231 = vector.multi_reduction <add>, %228, %cst_71 [1] : vector<16x16xf32> to vector<16xf32>
    %232 = vector.shape_cast %231 : vector<16xf32> to vector<16x1xf32>
    %cst_72 = arith.constant 1.600000e+01 : f32
    %233 = vector.broadcast %cst_72 : f32 to vector<16x1xf32>
    %234 = arith.divf %232, %233 : vector<16x1xf32>
    %235 = vector.broadcast %234 : vector<16x1xf32> to vector<16x16xf32>
    %236 = arith.subf %228, %235 : vector<16x16xf32>
    %237 = arith.mulf %236, %236 : vector<16x16xf32>
    %cst_73 = arith.constant dense<0.000000e+00> : vector<16xf32>
    %238 = vector.multi_reduction <add>, %237, %cst_73 [1] : vector<16x16xf32> to vector<16xf32>
    %239 = vector.shape_cast %238 : vector<16xf32> to vector<16x1xf32>
    %cst_74 = arith.constant 1.600000e+01 : f32
    %240 = vector.broadcast %cst_74 : f32 to vector<16x1xf32>
    %241 = arith.divf %239, %240 : vector<16x1xf32>
    %242 = vector.broadcast %234 : vector<16x1xf32> to vector<16x16xf32>
    %243 = arith.subf %228, %242 : vector<16x16xf32>
    %cst_75 = arith.constant 9.99999974E-6 : f32
    %244 = vector.broadcast %cst_75 : f32 to vector<16x1xf32>
    %245 = arith.addf %241, %244 : vector<16x1xf32>
    %246 = math.rsqrt %245 : vector<16x1xf32>
    %247 = vector.broadcast %246 : vector<16x1xf32> to vector<16x16xf32>
    %248 = arith.mulf %243, %247 : vector<16x16xf32>
    %249 = vector.broadcast %229 : vector<1x16xf32> to vector<16x16xf32>
    %250 = arith.mulf %248, %249 : vector<16x16xf32>
    %251 = vector.broadcast %230 : vector<1x16xf32> to vector<16x16xf32>
    %252 = arith.addf %250, %251 : vector<16x16xf32>
    %253 = arith.truncf %252 : vector<16x16xf32> to vector<16x16xbf16>
    %c80 = arith.constant 80 : index
    %c0_76 = arith.constant 0 : index
    %254 = vector.load %arg3[%c80, %c0_76] : memref<192x48xbf16, #tpu.memory_space<vmem>>, vector<16x32xbf16>
    %cst_77 = arith.constant dense<0.000000e+00> : vector<16x32xf32>
    %255 = tpu.matmul %253, %254, %cst_77 {dimension_numbers = #tpu.dot_dimension_numbers<[1], [0], [0], [1], [0, 0, 1, 1], [], []>} : vector<16x16xbf16>, vector<16x32xbf16>, vector<16x32xf32> -> vector<16x32xf32>
    %c76 = arith.constant 76 : index
    %c0_78 = arith.constant 0 : index
    %256 = vector.load %arg2[%c76, %c0_78] : memref<80x48xf32, #tpu.memory_space<vmem>>, vector<1x32xf32>
    %257 = vector.broadcast %256 : vector<1x32xf32> to vector<16x32xf32>
    %258 = arith.addf %255, %257 : vector<16x32xf32>
    %cst_79 = arith.constant 0.000000e+00 : f32
    %259 = vector.broadcast %cst_79 : f32 to vector<16x32xf32>
    %260 = arith.maximumf %258, %259 : vector<16x32xf32>
    %261 = arith.truncf %260 : vector<16x32xf32> to vector<16x32xbf16>
    %c128 = arith.constant 128 : index
    %c0_80 = arith.constant 0 : index
    %262 = vector.load %arg3[%c128, %c0_80] : memref<192x48xbf16, #tpu.memory_space<vmem>>, vector<32x16xbf16>
    %cst_81 = arith.constant dense<0.000000e+00> : vector<16x16xf32>
    %263 = tpu.matmul %261, %262, %cst_81 {dimension_numbers = #tpu.dot_dimension_numbers<[1], [0], [0], [1], [0, 0, 1, 1], [], []>} : vector<16x32xbf16>, vector<32x16xbf16>, vector<16x16xf32> -> vector<16x16xf32>
    %c77 = arith.constant 77 : index
    %c0_82 = arith.constant 0 : index
    %264 = vector.load %arg2[%c77, %c0_82] : memref<80x48xf32, #tpu.memory_space<vmem>>, vector<1x16xf32>
    %265 = vector.broadcast %264 : vector<1x16xf32> to vector<16x16xf32>
    %266 = arith.addf %263, %265 : vector<16x16xf32>
    %267 = arith.addf %252, %266 : vector<16x16xf32>
    %c78 = arith.constant 78 : index
    %c0_83 = arith.constant 0 : index
    %268 = vector.load %arg2[%c78, %c0_83] : memref<80x48xf32, #tpu.memory_space<vmem>>, vector<1x16xf32>
    %c79 = arith.constant 79 : index
    %c0_84 = arith.constant 0 : index
    %269 = vector.load %arg2[%c79, %c0_84] : memref<80x48xf32, #tpu.memory_space<vmem>>, vector<1x16xf32>
    %cst_85 = arith.constant dense<0.000000e+00> : vector<16xf32>
    %270 = vector.multi_reduction <add>, %267, %cst_85 [1] : vector<16x16xf32> to vector<16xf32>
    %271 = vector.shape_cast %270 : vector<16xf32> to vector<16x1xf32>
    %cst_86 = arith.constant 1.600000e+01 : f32
    %272 = vector.broadcast %cst_86 : f32 to vector<16x1xf32>
    %273 = arith.divf %271, %272 : vector<16x1xf32>
    %274 = vector.broadcast %273 : vector<16x1xf32> to vector<16x16xf32>
    %275 = arith.subf %267, %274 : vector<16x16xf32>
    %276 = arith.mulf %275, %275 : vector<16x16xf32>
    %cst_87 = arith.constant dense<0.000000e+00> : vector<16xf32>
    %277 = vector.multi_reduction <add>, %276, %cst_87 [1] : vector<16x16xf32> to vector<16xf32>
    %278 = vector.shape_cast %277 : vector<16xf32> to vector<16x1xf32>
    %cst_88 = arith.constant 1.600000e+01 : f32
    %279 = vector.broadcast %cst_88 : f32 to vector<16x1xf32>
    %280 = arith.divf %278, %279 : vector<16x1xf32>
    %281 = vector.broadcast %273 : vector<16x1xf32> to vector<16x16xf32>
    %282 = arith.subf %267, %281 : vector<16x16xf32>
    %cst_89 = arith.constant 9.99999974E-6 : f32
    %283 = vector.broadcast %cst_89 : f32 to vector<16x1xf32>
    %284 = arith.addf %280, %283 : vector<16x1xf32>
    %285 = math.rsqrt %284 : vector<16x1xf32>
    %286 = vector.broadcast %285 : vector<16x1xf32> to vector<16x16xf32>
    %287 = arith.mulf %282, %286 : vector<16x16xf32>
    %288 = vector.broadcast %268 : vector<1x16xf32> to vector<16x16xf32>
    %289 = arith.mulf %287, %288 : vector<16x16xf32>
    %290 = vector.broadcast %269 : vector<1x16xf32> to vector<16x16xf32>
    %291 = arith.addf %289, %290 : vector<16x16xf32>
    %292 = vector.extract_strided_slice %291 {offsets = [0, 0], sizes = [1, 16], strides = [1, 1]} : vector<16x16xf32> to vector<1x16xf32>
    %293 = vector.extract_strided_slice %291 {offsets = [1, 0], sizes = [1, 16], strides = [1, 1]} : vector<16x16xf32> to vector<1x16xf32>
    %294 = tpu.concatenate %292, %293 in 1 : vector<1x16xf32>, vector<1x16xf32> -> vector<1x32xf32>
    %295 = vector.extract_strided_slice %291 {offsets = [8, 0], sizes = [1, 16], strides = [1, 1]} : vector<16x16xf32> to vector<1x16xf32>
    %296 = vector.extract_strided_slice %291 {offsets = [9, 0], sizes = [1, 16], strides = [1, 1]} : vector<16x16xf32> to vector<1x16xf32>
    %297 = tpu.concatenate %295, %296 in 1 : vector<1x16xf32>, vector<1x16xf32> -> vector<1x32xf32>
    %298 = tpu.concatenate %294, %297 in 0 : vector<1x32xf32>, vector<1x32xf32> -> vector<2x32xf32>
    %299 = arith.truncf %298 : vector<2x32xf32> to vector<2x32xbf16>
    %c160 = arith.constant 160 : index
    %c0_90 = arith.constant 0 : index
    %300 = vector.load %arg3[%c160, %c0_90] : memref<192x48xbf16, #tpu.memory_space<vmem>>, vector<32x32xbf16>
    %cst_91 = arith.constant dense<0.000000e+00> : vector<2x32xf32>
    %301 = tpu.matmul %299, %300, %cst_91 {dimension_numbers = #tpu.dot_dimension_numbers<[1], [0], [0], [1], [0, 0, 1, 1], [], []>} : vector<2x32xbf16>, vector<32x32xbf16>, vector<2x32xf32> -> vector<2x32xf32>
    %c0_92 = arith.constant 0 : index
    %c0_93 = arith.constant 0 : index
    %302 = vector.load %arg4[%c0_92, %c0_93] : memref<2x32xf32, #tpu.memory_space<vmem>>, vector<2x32xf32>
    tpu.vector_store %arg4[%c0_92, %c0_93], %301 {strides = array<i32>} : memref<2x32xf32, #tpu.memory_space<vmem>>, vector<2x32xf32>,
    return
  }
}

</mosaic_0001>

<bundles_post_ra>
// kernel: attr_network_forward.1
= control target key start
LH: loop header
LB: loop body
LE: loop exit
PB: predicated region body
PF: predicated region fallthrough
CT: control target
= control target key end

     0   :  { %9 = vsyncpa [#allocation4], 0  ;;  %s2148_s0 = inlined_call_operand.vmem [shape: s32[2], index: 0, kind: input, shape index: {}]   ;;  %s2149_s1 = inlined_call_operand.vmem [shape: s32[16,1], index: 1, kind: input, shape index: {}]   ;;  %s2150_s2 = inlined_call_operand.vmem [shape: f32[80,48], index: 2, kind: input, shape index: {}]   ;;  %s2151_s3 = inlined_call_operand.vmem [shape: bf16[192,48], index: 3, kind: input, shape index: {}]   ;;  %s2152_s4 = inlined_call_operand.hbm [shape: f32[2,32], index: 4, kind: output, shape index: {}]  }
   0x1   :  { %10 = vsyncpa [#allocation3], 0  ;;  %s17_s17 = sshll.u32 %s2148_s0, 4  ;;  %s18_s17 = int_to_ptr.vmem [resolvable:$true] %s17_s17 }
   0x2   :  { %s1767_s18 = scalar_lea.vmem %s18_s17, 16  ;;  %p1772_p1 = scmp.lt.s32.totalorder %s18_s17, %s18_s17 }
   0x3   :  { %p1768_p0 = scmp.ne.s32.totalorder %s18_s17, %s1767_s18  ;;  %p1773_p2 = scmp.lt.s32.totalorder %s1767_s18, %s1767_s18 }
   0x5   :  { %p1774_p3 = por %p1773_p2, %p1772_p1 }
   0x7   :  { %p1775_p4 = pnand %p1774_p3, %p1768_p0 }
   0x9   :  { %1778 = shalt.err (!%p1775_p4)
}
   0xa   :  { %s1805_s19 = smov [#allocation2]  }
   0xb   :  { %20 = dma.vmem_to_smem %s18_s17, 16, %s1805_s19, [#allocation4]  }
   0xc   :  { %1801 = dma.done.wait [#allocation4], 16  }
   0xd   :  { %1802 = vsyncadd [#allocation4], 4294967280 }
   0xe   :  { %30 = sfence }
   0xf   :  { %v34_v0 = vld [vmem:[%s2149_s1] sm:$0xff]  ;;  %v1806_v2 = vmov 0   ;;  %v49_v3 = vld [vmem:[%s2150_s2 + $0x8] sm:$0xff]  ;;  %v50_v4 = vld [vmem:[%s2150_s2 + $0x10] sm:$0xff]  ;;  %v1807_v11 = vmov 0.0   ;;  %v32_v16 = vlaneseq  ;;  %vm56_vm0 = vcmask 523264  }
  0x10   :  { %v48_v1 = vld [vmem:[%s2150_s2] sm:$0xff]  ;;  %1696 = vset.pattern.permute.xlu0 %v1806_v2  ;;  %v51_v5 = vld [vmem:[%s2150_s2 + $0x18] sm:$0xff]  ;;  %v35_v6 = vld [vmem:[%s2149_s1 + $0x8] sm:$0xff]  ;;  %1559 = vmatprep.subr.bf16.mxu1 %v1807_v11  ;;  %vm1808_vm3 = vmmov 0   ;;  %vm194_vm4 = vcmask 130048   ;;  %s1809_s16 = smov 112  }
  0x11   :  { %37 = vperm.xlu0 %1696, %v34_v0   ;;  %v1667_v7 = vpack.c.bf16 %v49_v3, %v48_v1  ;;  %v1671_v8 = vpack.c.bf16 %v51_v5, %v50_v4  ;;  %v52_v9 = vld [vmem:[%s2150_s2 + $0x20] sm:$0xff]  ;;  %v53_v10 = vld [vmem:[%s2150_s2 + $0x28] sm:$0xff]  ;;  %v54_v12 = vld [vmem:[%s2150_s2 + $0x30] sm:$0xff]  ;;  %v1878_v17 = vand.u32 127, %v32_v16  ;;  %1561 = vmatprep.mubr.msk.bf16.mxu1 %vm1808_vm3, %v1807_v11  ;;  %s1810_s17 = smov 120   ;;  %s1811_s18 = smov 104  }
  0x12   :  { %v55_v13 = vld [vmem:[%s2150_s2 + $0x38] sm:$0xff]  ;;  %v1675_v14 = vpack.c.bf16 %v53_v10, %v52_v9  ;;  %v1707_v22 = vld [vmem:[%s2151_s3] sm:$0xff]   ;;  %vm246_vm5 = vcmask 64512   ;;  %s150_s19 = sld [smem:[#allocation2]]  ;;  %s1447_s20 = sld [smem:[#allocation2 + $0x1]]  ;;  %vm679_vm14 = vcmask 261120  }
  0x13   :  { %1668 = vmatprep.subr.bf16.mxu0 %v1667_v7  ;;  %v1679_v15 = vpack.c.bf16 %v55_v13, %v54_v12  ;;  %1560 = vmatpush3.bf16.msra.mxu1 %v1707_v22  ;;  %v1448_v26 = vld [vmem:[%s2150_s2 + $0x40] ss:$0 sm:$0xff]  ;;  %v1446_v43 = vadd.s32 4294967288, %v1878_v17  ;;  %vm164_vm6 = vcmp.ge.s32.totalorder %v1878_v17, 8  ;;  %vm165_vm7 = vcmp.lt.s32.totalorder %v1878_v17, 16  ;;  %s1813_s23 = smov 88  }
  0x14   :  { %1670 = vmatpush3.bf16.msra.mxu0 %v1667_v7  ;;  %1565 = vmatprep.subr.bf16.mxu1 %v1807_v11  ;;  %vm148_vm8 = vcmp.lt.s32.totalorder %v1878_v17, 8  ;;  %vm166_vm10 = vmand %vm164_vm6, %vm165_vm7  ;;  %v1812_v45 = vmov -1e+30   ;;  %s1814_s0 = smov 96   ;;  %s1815_s26 = smov 8   ;;  %vm1363_vm15 = vcmask 1040384  }
  0x15   :  { %40 = vperm.xlu0 %1696, %v35_v6   ;;  %1672 = vmatprep.subr.bf16.mxu0 %v1671_v8  ;;  %s1816_s27 = smov 16  }
  0x18   :  { %1674 = vmatpush3.bf16.msra.mxu0 %v1671_v8  ;;  %s151_s21 = sadd.s32 2, %s150_s19  ;;  %s169_s22 = sadd.s32 2, %s1447_s20 }
  0x19   :  { %1676 = vmatprep.subr.bf16.mxu0 %v1675_v14  ;;  %v152_v42 = vstv %s151_s21  ;;  %v170_v44 = vstv %s169_s22 }
  0x1a   :  { %vm153_vm9 = vcmp.lt.s32.totalorder %v1878_v17, %v152_v42  ;;  %vm171_vm11 = vcmp.lt.s32.totalorder %v1446_v43, %v170_v44 }
  0x1b   :  { %vm156_vm12 = vmand %vm148_vm8, %vm153_vm9 }
  0x1c   :  { %1678 = vmatpush3.bf16.msra.mxu0 %v1675_v14  ;;  %vm175_vm13 = vmand %vm166_vm10, %vm171_vm11  ;;  %v1926_v46 = vsel %vm156_vm12, 0.0, %v1812_v45 }
  0x1d   :  { %1680 = vmatprep.subr.bf16.mxu0 %v1679_v15  ;;  %v1928_v48 = vsel %vm175_vm13, 0.0, %v1812_v45 }
  0x20   :  { %1682 = vmatpush3.bf16.msra.mxu0 %v1679_v15 }
  0x21   :  { %1571 = vmatprep.subr.bf16.mxu0 %v1807_v11 }
  0x90   :  { %v38_v18 = vpop.permute.xlu0 %37 }
  0x91   :  { %vm42_vm1 = vcmp.eq.s32.totalorder %v1878_v17, %v38_v18 }
  0x92   :  { %v1442_v19 = vsel %vm42_vm1, 1.0, %v1807_v11 }
  0x93   :  { %1556 = vmatprep.mubr.msk.f32.mxu0 %vm56_vm0, %v1442_v19 }
  0x94   :  { %v41_v20 = vpop.permute.xlu0 %40 }
  0x95   :  { %vm43_vm2 = vcmp.eq.s32.totalorder %v1878_v17, %v41_v20 }
  0x96   :  { %v1443_v21 = vsel %vm43_vm2, 1.0, %v1807_v11 }
  0x97   :  { %1557 = vmatmul.mubr.msk.f32.vlgmr.msra.gmra.mrb[0].mxu0 %vm56_vm0, %v1443_v21  ;;  %vm1425_vm0 = vcmask 254976  }
  0x98   :  { %1573 = vmatprep.mubr.msk.bf16.mxu0 %vm1808_vm3, %v1807_v11 }
 0x16a   :  { %v1892_v23 = vpop.f32.mrb[0].mxu0 }
 0x16b   :  { %v1894_v24 = vpop.f32.mrb[1].mxu0 }
 0x16c   :  { %v180_v25 = vpack.c.bf16 %v1892_v23, %v1894_v24 }
 0x16e   :  { %1562 = vmatmul.mubr.msk.bf16.vlgmr.msra.gmra.mrb[0].mxu1 %vm194_vm4, %v180_v25 }
 0x16f   :  { %1567 = vmatprep.mubr.msk.bf16.mxu1 %vm1808_vm3, %v1807_v11 }
 0x241   :  { %v232_v27 = vpop.f32.mrb[0].mxu1 }
 0x242   :  { %v233_v28 = vadd.f32 %v1448_v26, %v232_v27  ;;  %v1563_v29 = vpop.f32.mrb[1].mxu1 }
 0x243   :  { %v235_v30 = vpop.f32.mrb[2].mxu1 }
 0x244   :  { %v236_v31 = vadd.f32 %v1448_v26, %v235_v30  ;;  %v1564_v32 = vpop.f32.mrb[3].mxu1  ;;  %v239_v33 = vmul.f32 0.35355338, %v233_v28 }
 0x246   :  { %v240_v34 = vmul.f32 0.35355338, %v236_v31  ;;  %v1904_v35 = vpack.c.bf16 %v236_v31, %v233_v28 }
 0x248   :  { %244 = vrot.lane.b32.xlu1 %v1904_v35, %s1809_s16  ;;  %v241_v36 = vpack.c.bf16 %v240_v34, %v239_v33 }
 0x24a   :  { %365 = vrot.lane.b32.xlu0 %v241_v36, %s1810_s17 }
 0x24c   :  { %367 = vrot.lane.b32.xlu1 %v1904_v35, %s1811_s18 }
 0x2ba   :  { %v245_v37 = vpop.permute.xlu1 %244 }
 0x2bb   :  { %v251_v38 = vsel %vm246_vm5, %v245_v37, 0 }
 0x2bc   :  { %1566 = vmatpush3.bf16.xpose.msra.mxu1 %v251_v38  ;;  %v366_v41 = vpop.permute.xlu0 %365 }
 0x2bd   :  { %1577 = vmatprep.subr.bf16.mxu1 %v1807_v11 }
 0x2be   :  { %v368_v39 = vpop.permute.xlu1 %367 }
 0x2bf   :  { %v373_v40 = vsel %vm246_vm5, %v368_v39, 0 }
 0x2c3   :  { %1568 = vmatmul.mubr.msk.bf16.vlgmr.msra.gmra.mrb[4].mxu1 %vm246_vm5, %v241_v36 }
 0x2c4   :  { %1578 = vmatpush3.bf16.xpose.msra.mxu1 %v373_v40  ;;  %1579 = vmatprep.mubr.msk.bf16.mxu1 %vm1808_vm3, %v1807_v11 }
 0x2c5   :  { %1589 = vmatprep.subr.bf16.mxu1 %v1807_v11 }
 0x2cb   :  { %1580 = vmatmul.mubr.msk.bf16.vlgmr.msra.gmra.mrb[8].mxu1 %vm246_vm5, %v366_v41  ;;  %v1708_v41 = vld [vmem:[%s2151_s3 + $0x10] sm:$0xff]  }
 0x2cc   :  { %1591 = vmatprep.mubr.msk.bf16.mxu1 %vm1808_vm3, %v1807_v11  ;;  %1590 = vmatpush3.bf16.msra.mxu1 %v1708_v41 }
 0x2cd   :  { %1601 = vmatprep.subr.bf16.mxu1 %v1807_v11 }
 0x396   :  { %v287_v47 = vpop.f32.mrb[4].mxu1 }
 0x397   :  { %v288_v49 = vadd.f32 %v287_v47, %v1926_v46  ;;  %v1569_v50 = vpop.f32.mrb[5].mxu1 }
 0x398   :  { %v290_v51 = vpop.f32.mrb[6].mxu1 }
 0x399   :  { %v291_v52 = vadd.f32 %v290_v51, %v1928_v48  ;;  %v1570_v53 = vpop.f32.mrb[7].mxu1  ;;  %v294_v54 = vsel %vm194_vm4, %v288_v49, -inf }
 0x39a   :  { %295 = vmax.xlane.f32.xlu1 %v294_v54 }
 0x39b   :  { %v297_v55 = vsel %vm194_vm4, %v291_v52, -inf }
 0x39c   :  { %298 = vmax.xlane.f32.xlu0 %v297_v55 }
 0x39e   :  { %v409_v56 = vpop.f32.mrb[8].mxu1 }
 0x39f   :  { %v410_v57 = vadd.f32 %v409_v56, %v1926_v46  ;;  %v1581_v58 = vpop.f32.mrb[9].mxu1 }
 0x3a0   :  { %v412_v59 = vpop.f32.mrb[10].mxu1 }
 0x3a1   :  { %v413_v60 = vadd.f32 %v412_v59, %v1928_v48  ;;  %v1582_v61 = vpop.f32.mrb[11].mxu1  ;;  %v416_v62 = vsel %vm194_vm4, %v410_v57, -inf }
 0x3a2   :  { %417 = vmax.xlane.f32.xlu0 %v416_v62 }
 0x3a3   :  { %v419_v63 = vsel %vm194_vm4, %v413_v60, -inf }
 0x3a4   :  { %420 = vmax.xlane.f32.xlu1 %v419_v63 }
 0x427   :  { %v296_v0 = vpop.xlane.xlu1 %295 }
 0x428   :  { %v300_v1 = vsub.f32 %v288_v49, %v296_v0 }
 0x429   :  { %v299_v2 = vpop.xlane.xlu0 %298 }
 0x42a   :  { %v302_v3 = vmul.f32 1.442695, %v300_v1  ;;  %v301_v4 = vsub.f32 %v291_v52, %v299_v2 }
 0x42c   :  { %1719 = vpow2.f32 %v302_v3  ;;  %v304_v5 = vmul.f32 1.442695, %v301_v4 }
 0x42e   :  { %1721 = vpow2.f32 %v304_v5 }
 0x42f   :  { %v418_v6 = vpop.xlane.xlu0 %417 }
 0x430   :  { %v422_v7 = vsub.f32 %v410_v57, %v418_v6  ;;  %v1455_v57 = vld [vmem:[%s2150_s2 + $0x41] ss:$0 sm:$0xff] }
 0x431   :  { %v421_v8 = vpop.xlane.xlu1 %420 }
 0x432   :  { %v424_v9 = vmul.f32 1.442695, %v422_v7  ;;  %v423_v10 = vsub.f32 %v413_v60, %v421_v8 }
 0x434   :  { %1723 = vpow2.f32 %v424_v9  ;;  %v426_v12 = vmul.f32 1.442695, %v423_v10 }
 0x436   :  { %v1720_v13 = vpop.eup %1719  ;;  %1725 = vpow2.f32 %v426_v12 }
 0x437   :  { %v306_v14 = vsel %vm194_vm4, %v1720_v13, 0.0 }
 0x438   :  { %v1722_v15 = vpop.eup %1721  ;;  %307 = vadd.xlane.f32.xlu0 %v306_v14 }
 0x439   :  { %v309_v16 = vsel %vm194_vm4, %v1722_v15, 0.0 }
 0x43a   :  { %310 = vadd.xlane.f32.xlu1 %v309_v16 }
 0x43e   :  { %v1724_v17 = vpop.eup %1723 }
 0x43f   :  { %v428_v18 = vsel %vm194_vm4, %v1724_v17, 0.0 }
 0x440   :  { %v1726_v19 = vpop.eup %1725  ;;  %429 = vadd.xlane.f32.xlu0 %v428_v18 }
 0x441   :  { %v431_v20 = vsel %vm194_vm4, %v1726_v19, 0.0 }
 0x442   :  { %432 = vadd.xlane.f32.xlu1 %v431_v20 }
 0x453   :  { %439 = vrot.lane.b32.xlu1 %v1904_v35, %s1813_s23 }
 0x456   :  { %317 = vrot.lane.b32.xlu0 %v1904_v35, %s1814_s0 }
 0x4c5   :  { %v308_v21 = vpop.xlane.xlu0 %307 }
 0x4c6   :  { %1727 = vrcp.f32 %v308_v21 }
 0x4c7   :  { %v311_v22 = vpop.xlane.xlu1 %310 }
 0x4c8   :  { %1729 = vrcp.f32 %v311_v22  ;;  %v1458_v22 = vld [vmem:[%s2150_s2 + $0x42] ss:$0 sm:$0xff] }
 0x4cd   :  { %v430_v25 = vpop.xlane.xlu0 %429 }
 0x4ce   :  { %1731 = vrcp.f32 %v430_v25 }
 0x4cf   :  { %v433_v26 = vpop.xlane.xlu1 %432 }
 0x4d0   :  { %v1728_v27 = vpop.eup %1727  ;;  %1733 = vrcp.f32 %v433_v26 }
 0x4d1   :  { %v318_v28 = vpop.permute.xlu0 %317  ;;  %v314_v30 = vmul.f32 %v1728_v27, %v1720_v13 }
 0x4d2   :  { %v1730_v29 = vpop.eup %1729  ;;  %1572 = vmatpush3.bf16.msra.mxu0 %v318_v28  ;;  %v1459_v28 = vld [vmem:[%s2150_s2 + $0x43] ss:$0 sm:$0xff] }
 0x4d3   :  { %v315_v31 = vmul.f32 %v1730_v29, %v1722_v15  ;;  %1583 = vmatprep.subr.bf16.mxu0 %v1807_v11  ;;  %v440_v33 = vpop.permute.xlu1 %439 }
 0x4d5   :  { %v316_v32 = vpack.c.bf16 %v315_v31, %v314_v30 }
 0x4d7   :  { %1574 = vmatmul.mubr.msk.bf16.vlgmr.msra.gmra.mrb[4].mxu0 %vm194_vm4, %v316_v32 }
 0x4d8   :  { %v1732_v34 = vpop.eup %1731  ;;  %1584 = vmatpush3.bf16.msra.mxu0 %v440_v33  ;;  %1585 = vmatprep.mubr.msk.bf16.mxu0 %vm1808_vm3, %v1807_v11  ;;  %v1710_v33 = vld [vmem:[%s2151_s3 + $0x30] sm:$0xff]  }
 0x4d9   :  { %1595 = vmatprep.subr.bf16.mxu0 %v1807_v11  ;;  %v436_v36 = vmul.f32 %v1732_v34, %v1724_v17  ;;  %v1711_v34 = vld [vmem:[%s2151_s3 + $0x38] sm:$0xff]  }
 0x4da   :  { %v1734_v35 = vpop.eup %1733 }
 0x4db   :  { %v437_v37 = vmul.f32 %v1734_v35, %v1726_v19  ;;  %v1460_v35 = vld [vmem:[%s2150_s2 + $0x44] ss:$0 sm:$0xff] }
 0x4dd   :  { %v438_v38 = vpack.c.bf16 %v437_v37, %v436_v36 }
 0x4df   :  { %1586 = vmatmul.mubr.msk.bf16.vlgmr.msra.gmra.mrb[8].mxu0 %vm194_vm4, %v438_v38 }
 0x4e0   :  { %1597 = vmatprep.mubr.msk.bf16.mxu0 %vm1808_vm3, %v1807_v11 }
 0x5aa   :  { %v357_v39 = vpop.f32.mrb[4].mxu0 }
 0x5ab   :  { %v1575_v40 = vpop.f32.mrb[5].mxu0 }
 0x5ac   :  { %v360_v42 = vpop.f32.mrb[6].mxu0 }
 0x5ad   :  { %v1576_v43 = vpop.f32.mrb[7].mxu0 }
 0x5b2   :  { %v479_v44 = vpop.f32.mrb[8].mxu0 }
 0x5b3   :  { %v1587_v45 = vpop.f32.mrb[9].mxu0 }
 0x5b4   :  { %v482_v47 = vpop.f32.mrb[10].mxu0  ;;  %v1463_v45 = vld [vmem:[%s2150_s2 + $0x45] ss:$0 sm:$0xff] }
 0x5b5   :  { %v1697_v49 = vpack.i.bf16 %v482_v47, %v479_v44  ;;  %v1588_v50 = vpop.f32.mrb[11].mxu0 }
 0x5b7   :  { %1698 = vrot.lane.b32.xlu1 %v1697_v49, %s1815_s26 }
 0x629   :  { %v1699_v51 = vpop.permute.xlu1 %1698 }
 0x62a   :  { %v1701_v52 = vunpack.i.h.bf16 %v1699_v51  ;;  %v1700_v53 = vunpack.i.l.bf16 %v1699_v51 }
 0x62c   :  { %v495_v54 = vsel %vm246_vm5, %v360_v42, %v1701_v52  ;;  %v494_v55 = vsel %vm246_vm5, %v357_v39, %v1700_v53 }
 0x62d   :  { %v496_v56 = vpack.c.bf16 %v495_v54, %v494_v55 }
 0x62f   :  { %1592 = vmatmul.mubr.msk.bf16.vlgmr.msra.gmra.mrb[12].mxu1 %vm194_vm4, %v496_v56 }
 0x630   :  { %1605 = vmatprep.mubr.msk.bf16.mxu1 %vm1808_vm3, %v1807_v11  ;;  %1602 = vmatpush3.bf16.msra.mxu1 %v1710_v33 }
 0x631   :  { %1603 = vmatprep.subr.bf16.mxu1 %v1807_v11 }
 0x634   :  { %1604 = vmatpush3.bf16.msra.mxu1 %v1711_v34 }
 0x635   :  { %1615 = vmatprep.subr.bf16.mxu1 %v1807_v11 }
 0x702   :  { %v547_v58 = vpop.f32.mrb[12].mxu1 }
 0x703   :  { %v548_v59 = vadd.f32 %v1455_v57, %v547_v58  ;;  %v1593_v60 = vpop.f32.mrb[13].mxu1 }
 0x704   :  { %v550_v61 = vpop.f32.mrb[14].mxu1 }
 0x705   :  { %v551_v62 = vadd.f32 %v1455_v57, %v550_v61  ;;  %v1594_v63 = vpop.f32.mrb[15].mxu1  ;;  %v554_v0 = vadd.f32 %v548_v59, %v1894_v24 }
 0x707   :  { %v558_v1 = vsel %vm194_vm4, %v554_v0, 0.0  ;;  %v555_v2 = vadd.f32 %v1892_v23, %v551_v62  ;;  %v1709_v23 = vld [vmem:[%s2151_s3 + $0x20] sm:$0xff]  }
 0x708   :  { %559 = vadd.xlane.f32.xlu0 %v558_v1  ;;  %1596 = vmatpush3.bf16.msra.mxu0 %v1709_v23 }
 0x709   :  { %v561_v3 = vsel %vm194_vm4, %v555_v2, 0.0  ;;  %1609 = vmatprep.subr.bf16.mxu0 %v1807_v11 }
 0x70a   :  { %562 = vadd.xlane.f32.xlu1 %v561_v3 }
 0x795   :  { %v560_v4 = vpop.xlane.xlu0 %559 }
 0x796   :  { %v565_v5 = vmul.f32 0.0625, %v560_v4  ;;  %v1712_v4 = vld [vmem:[%s2151_s3 + $0x8] sm:$0xff]  }
 0x797   :  { %v563_v6 = vpop.xlane.xlu1 %562 }
 0x798   :  { %v567_v7 = vsub.f32 %v554_v0, %v565_v5  ;;  %v566_v8 = vmul.f32 0.0625, %v563_v6 }
 0x79a   :  { %v568_v9 = vsub.f32 %v555_v2, %v566_v8  ;;  %v569_v10 = vmul.f32 %v567_v7, %v567_v7 }
 0x79c   :  { %v571_v12 = vsel %vm194_vm4, %v569_v10, 0.0  ;;  %v570_v13 = vmul.f32 %v568_v9, %v568_v9 }
 0x79d   :  { %572 = vadd.xlane.f32.xlu0 %v571_v12 }
 0x79e   :  { %v574_v24 = vsel %vm194_vm4, %v570_v13, 0.0  ;;  %v1467_v13 = vld [vmem:[%s2150_s2 + $0x46] ss:$0 sm:$0xff] }
 0x7a1   :  { %575 = vadd.xlane.f32.xlu0 %v574_v24 }
 0x82a   :  { %v573_v14 = vpop.xlane.xlu0 %572 }
 0x82b   :  { %v577_v15 = vmul.f32 0.0625, %v573_v14 }
 0x82d   :  { %v579_v16 = vadd.f32 1e-05, %v577_v15 }
 0x82e   :  { %v576_v17 = vpop.xlane.xlu0 %575 }
 0x82f   :  { %1735 = vrsqrt.f32 %v579_v16  ;;  %v578_v18 = vmul.f32 0.0625, %v576_v17  ;;  %v1468_v16 = vld [vmem:[%s2150_s2 + $0x47] ss:$0 sm:$0xff] }
 0x831   :  { %v580_v19 = vadd.f32 1e-05, %v578_v18 }
 0x833   :  { %1737 = vrsqrt.f32 %v580_v19 }
 0x839   :  { %v1736_v20 = vpop.eup %1735 }
 0x83a   :  { %v583_v21 = vmul.f32 %v1736_v20, %v567_v7 }
 0x83c   :  { %v589_v26 = vmul.f32 %v1458_v22, %v583_v21  ;;  %v1469_v21 = vld [vmem:[%s2150_s2 + $0x48] ss:$0 sm:$0xff] }
 0x83d   :  { %v1738_v25 = vpop.eup %1737 }
 0x83e   :  { %v584_v27 = vmul.f32 %v1738_v25, %v568_v9  ;;  %v595_v30 = vadd.f32 %v1459_v28, %v589_v26 }
 0x840   :  { %v590_v29 = vmul.f32 %v1458_v22, %v584_v27 }
 0x842   :  { %v596_v31 = vadd.f32 %v1459_v28, %v590_v29 }
 0x844   :  { %v597_v32 = vpack.c.bf16 %v596_v31, %v595_v30 }
 0x846   :  { %1598 = vmatmul.mubr.msk.bf16.vlgmr.msra.gmra.mrb[12].mxu0 %vm194_vm4, %v597_v32 }
 0x847   :  { %1611 = vmatprep.mubr.msk.bf16.mxu0 %vm1808_vm3, %v1807_v11  ;;  %1610 = vmatpush3.bf16.msra.mxu0 %v1712_v4 }
 0x848   :  { %1621 = vmatprep.subr.bf16.mxu0 %v1807_v11 }
 0x919   :  { %v648_v36 = vpop.f32.mrb[12].mxu0 }
 0x91a   :  { %v649_v37 = vadd.f32 %v1460_v35, %v648_v36  ;;  %v1599_v38 = vpop.f32.mrb[13].mxu0 }
 0x91b   :  { %v651_v39 = vpop.f32.mrb[14].mxu0 }
 0x91c   :  { %v652_v40 = vadd.f32 %v1460_v35, %v651_v39  ;;  %v1600_v41 = vpop.f32.mrb[15].mxu0  ;;  %v655_v42 = vmax.f32 %v649_v37, 0.0 }
 0x91e   :  { %v656_v43 = vmax.f32 %v652_v40, 0.0 }
 0x920   :  { %v657_v44 = vpack.c.bf16 %v656_v43, %v655_v42 }
 0x922   :  { %1606 = vmatmul.mubr.msk.bf16.vlgmr.msra.gmra.mrb[16].mxu1 %vm679_vm14, %v657_v44 }
 0x923   :  { %1617 = vmatprep.mubr.msk.bf16.mxu1 %vm1808_vm3, %v1807_v11 }
 0x9f5   :  { %v717_v47 = vpop.f32.mrb[16].mxu1 }
 0x9f6   :  { %v718_v49 = vadd.f32 %v1463_v45, %v717_v47  ;;  %v1607_v50 = vpop.f32.mrb[17].mxu1 }
 0x9f7   :  { %v720_v51 = vpop.f32.mrb[18].mxu1 }
 0x9f8   :  { %v721_v52 = vadd.f32 %v1463_v45, %v720_v51  ;;  %v1608_v53 = vpop.f32.mrb[19].mxu1  ;;  %v724_v54 = vadd.f32 %v718_v49, %v595_v30 }
 0x9fa   :  { %v728_v55 = vsel %vm194_vm4, %v724_v54, 0.0  ;;  %v725_v56 = vadd.f32 %v721_v52, %v596_v31 }
 0x9fb   :  { %729 = vadd.xlane.f32.xlu1 %v728_v55 }
 0x9fc   :  { %v731_v57 = vsel %vm194_vm4, %v725_v56, 0.0 }
 0x9fd   :  { %732 = vadd.xlane.f32.xlu0 %v731_v57 }
 0xa88   :  { %v730_v58 = vpop.xlane.xlu1 %729 }
 0xa89   :  { %v734_v59 = vmul.f32 0.0625, %v730_v58 }
 0xa8a   :  { %v733_v60 = vpop.xlane.xlu0 %732 }
 0xa8b   :  { %v736_v61 = vsub.f32 %v724_v54, %v734_v59  ;;  %v735_v62 = vmul.f32 0.0625, %v733_v60 }
 0xa8d   :  { %v737_v63 = vsub.f32 %v725_v56, %v735_v62  ;;  %v738_v0 = vmul.f32 %v736_v61, %v736_v61 }
 0xa8f   :  { %v740_v1 = vsel %vm194_vm4, %v738_v0, 0.0  ;;  %v739_v2 = vmul.f32 %v737_v63, %v737_v63 }
 0xa90   :  { %741 = vadd.xlane.f32.xlu1 %v740_v1 }
 0xa91   :  { %v743_v3 = vsel %vm194_vm4, %v739_v2, 0.0 }
 0xa92   :  { %744 = vadd.xlane.f32.xlu0 %v743_v3 }
 0xb1d   :  { %v742_v5 = vpop.xlane.xlu1 %741 }
 0xb1e   :  { %v746_v6 = vmul.f32 0.0625, %v742_v5 }
 0xb1f   :  { %v745_v7 = vpop.xlane.xlu0 %744 }
 0xb20   :  { %v748_v8 = vadd.f32 1e-05, %v746_v6  ;;  %v747_v9 = vmul.f32 0.0625, %v745_v7 }
 0xb22   :  { %1739 = vrsqrt.f32 %v748_v8  ;;  %v749_v10 = vadd.f32 1e-05, %v747_v9 }
 0xb24   :  { %1741 = vrsqrt.f32 %v749_v10 }
 0xb2c   :  { %v1740_v12 = vpop.eup %1739 }
 0xb2d   :  { %v752_v24 = vmul.f32 %v1740_v12, %v736_v61 }
 0xb2e   :  { %v1742_v23 = vpop.eup %1741 }
 0xb2f   :  { %v758_v14 = vmul.f32 %v1467_v13, %v752_v24  ;;  %v753_v15 = vmul.f32 %v1742_v23, %v737_v63 }
 0xb31   :  { %v759_v17 = vmul.f32 %v1467_v13, %v753_v15  ;;  %v2017_v18 = vadd.f32 %v1468_v16, %v758_v14 }
 0xb33   :  { %v2019_v19 = vadd.f32 %v1468_v16, %v759_v17 }
 0xb35   :  { %v766_v20 = vpack.c.bf16 %v2019_v19, %v2017_v18 }
 0xb37   :  { %1612 = vmatmul.mubr.msk.bf16.vlgmr.msra.gmra.mrb[16].mxu0 %vm194_vm4, %v766_v20 }
 0xb38   :  { %1623 = vmatprep.mubr.msk.bf16.mxu0 %vm1808_vm3, %v1807_v11 }
 0xc0a   :  { %v817_v22 = vpop.f32.mrb[16].mxu0 }
 0xc0b   :  { %v818_v25 = vadd.f32 %v1469_v21, %v817_v22  ;;  %v1613_v26 = vpop.f32.mrb[17].mxu0 }
 0xc0c   :  { %v820_v27 = vpop.f32.mrb[18].mxu0 }
 0xc0d   :  { %v821_v28 = vadd.f32 %v1469_v21, %v820_v27  ;;  %v1614_v29 = vpop.f32.mrb[19].mxu0  ;;  %v824_v30 = vmul.f32 0.35355338, %v818_v25 }
 0xc0f   :  { %v825_v31 = vmul.f32 0.35355338, %v821_v28  ;;  %v2029_v32 = vpack.c.bf16 %v821_v28, %v818_v25 }
 0xc11   :  { %951 = vrot.lane.b32.xlu0 %v2029_v32, %s1811_s18  ;;  %829 = vrot.lane.b32.xlu1 %v2029_v32, %s1809_s16  ;;  %v826_v33 = vpack.c.bf16 %v825_v31, %v824_v30 }
 0xc15   :  { %949 = vrot.lane.b32.xlu1 %v826_v33, %s1810_s17 }
 0xc83   :  { %v830_v34 = vpop.permute.xlu1 %829  ;;  %v952_v36 = vpop.permute.xlu0 %951 }
 0xc84   :  { %v835_v35 = vsel %vm246_vm5, %v830_v34, 0  ;;  %v957_v37 = vsel %vm246_vm5, %v952_v36, 0 }
 0xc85   :  { %1616 = vmatpush3.bf16.xpose.msra.mxu1 %v835_v35 }
 0xc86   :  { %1627 = vmatprep.subr.bf16.mxu1 %v1807_v11 }
 0xc87   :  { %v950_v38 = vpop.permute.xlu1 %949 }
 0xc8c   :  { %1618 = vmatmul.mubr.msk.bf16.vlgmr.msra.gmra.mrb[20].mxu1 %vm246_vm5, %v826_v33 }
 0xc8d   :  { %1628 = vmatpush3.bf16.xpose.msra.mxu1 %v957_v37  ;;  %1629 = vmatprep.mubr.msk.bf16.mxu1 %vm1808_vm3, %v1807_v11 }
 0xc8e   :  { %1639 = vmatprep.subr.bf16.mxu1 %v1807_v11 }
 0xc94   :  { %1630 = vmatmul.mubr.msk.bf16.vlgmr.msra.gmra.mrb[24].mxu1 %vm246_vm5, %v950_v38 }
 0xc95   :  { %1641 = vmatprep.mubr.msk.bf16.mxu1 %vm1808_vm3, %v1807_v11 }
 0xd5f   :  { %v871_v39 = vpop.f32.mrb[20].mxu1 }
 0xd60   :  { %v872_v40 = vadd.f32 %v871_v39, %v1926_v46  ;;  %v1619_v41 = vpop.f32.mrb[21].mxu1 }
 0xd61   :  { %v874_v42 = vpop.f32.mrb[22].mxu1 }
 0xd62   :  { %v875_v43 = vadd.f32 %v874_v42, %v1928_v48  ;;  %v1620_v44 = vpop.f32.mrb[23].mxu1  ;;  %v878_v45 = vsel %vm194_vm4, %v872_v40, -inf }
 0xd63   :  { %879 = vmax.xlane.f32.xlu1 %v878_v45 }
 0xd64   :  { %v881_v47 = vsel %vm194_vm4, %v875_v43, -inf }
 0xd65   :  { %882 = vmax.xlane.f32.xlu0 %v881_v47  ;;  %v1476_v47 = vld [vmem:[%s2150_s2 + $0x49] ss:$0 sm:$0xff] }
 0xd67   :  { %v993_v49 = vpop.f32.mrb[24].mxu1 }
 0xd68   :  { %v994_v50 = vadd.f32 %v993_v49, %v1926_v46  ;;  %v1631_v51 = vpop.f32.mrb[25].mxu1 }
 0xd69   :  { %v996_v52 = vpop.f32.mrb[26].mxu1 }
 0xd6a   :  { %v997_v53 = vadd.f32 %v996_v52, %v1928_v48  ;;  %v1632_v54 = vpop.f32.mrb[27].mxu1  ;;  %v1000_v55 = vsel %vm194_vm4, %v994_v50, -inf }
 0xd6b   :  { %1001 = vmax.xlane.f32.xlu0 %v1000_v55 }
 0xd6c   :  { %v1003_v56 = vsel %vm194_vm4, %v997_v53, -inf }
 0xd6d   :  { %1004 = vmax.xlane.f32.xlu1 %v1003_v56 }
 0xdf0   :  { %v880_v57 = vpop.xlane.xlu1 %879 }
 0xdf1   :  { %v884_v58 = vsub.f32 %v872_v40, %v880_v57 }
 0xdf2   :  { %v883_v59 = vpop.xlane.xlu0 %882 }
 0xdf3   :  { %v886_v60 = vmul.f32 1.442695, %v884_v58  ;;  %v885_v61 = vsub.f32 %v875_v43, %v883_v59 }
 0xdf5   :  { %1743 = vpow2.f32 %v886_v60  ;;  %v888_v62 = vmul.f32 1.442695, %v885_v61 }
 0xdf7   :  { %1745 = vpow2.f32 %v888_v62 }
 0xdf8   :  { %v1002_v46 = vpop.xlane.xlu0 %1001 }
 0xdf9   :  { %v1006_v63 = vsub.f32 %v994_v50, %v1002_v46 }
 0xdfa   :  { %v1005_v0 = vpop.xlane.xlu1 %1004 }
 0xdfb   :  { %v1008_v1 = vmul.f32 1.442695, %v1006_v63  ;;  %v1007_v48 = vsub.f32 %v997_v53, %v1005_v0 }
 0xdfd   :  { %1747 = vpow2.f32 %v1008_v1  ;;  %v1010_v2 = vmul.f32 1.442695, %v1007_v48 }
 0xdff   :  { %v1744_v3 = vpop.eup %1743  ;;  %1749 = vpow2.f32 %v1010_v2 }
 0xe00   :  { %v890_v4 = vsel %vm194_vm4, %v1744_v3, 0.0 }
 0xe01   :  { %v1746_v5 = vpop.eup %1745  ;;  %891 = vadd.xlane.f32.xlu0 %v890_v4 }
 0xe02   :  { %v893_v6 = vsel %vm194_vm4, %v1746_v5, 0.0 }
 0xe03   :  { %894 = vadd.xlane.f32.xlu1 %v893_v6 }
 0xe07   :  { %v1748_v7 = vpop.eup %1747 }
 0xe08   :  { %v1012_v8 = vsel %vm194_vm4, %v1748_v7, 0.0 }
 0xe09   :  { %v1750_v9 = vpop.eup %1749  ;;  %1013 = vadd.xlane.f32.xlu0 %v1012_v8 }
 0xe0a   :  { %v1015_v10 = vsel %vm194_vm4, %v1750_v9, 0.0 }
 0xe0b   :  { %1016 = vadd.xlane.f32.xlu1 %v1015_v10  ;;  %v1479_v10 = vld [vmem:[%s2150_s2 + $0x4a] ss:$0 sm:$0xff] }
 0xe1c   :  { %1023 = vrot.lane.b32.xlu1 %v2029_v32, %s1813_s23 }
 0xe1f   :  { %901 = vrot.lane.b32.xlu0 %v2029_v32, %s1814_s0  ;;  %v1713_v32 = vld [vmem:[%s2151_s3 + $0x18] sm:$0xff]  }
 0xe20   :  { %1640 = vmatpush3.bf16.msra.mxu1 %v1713_v32 }
 0xe21   :  { %1651 = vmatprep.subr.bf16.mxu1 %v1807_v11 }
 0xe8e   :  { %v892_v12 = vpop.xlane.xlu0 %891 }
 0xe8f   :  { %1751 = vrcp.f32 %v892_v12 }
 0xe90   :  { %v895_v13 = vpop.xlane.xlu1 %894 }
 0xe91   :  { %1753 = vrcp.f32 %v895_v13 }
 0xe96   :  { %v1014_v24 = vpop.xlane.xlu0 %1013 }
 0xe97   :  { %1755 = vrcp.f32 %v1014_v24 }
 0xe98   :  { %v1017_v23 = vpop.xlane.xlu1 %1016 }
 0xe99   :  { %v1752_v14 = vpop.eup %1751  ;;  %1757 = vrcp.f32 %v1017_v23  ;;  %v1480_v23 = vld [vmem:[%s2150_s2 + $0x4b] ss:$0 sm:$0xff] }
 0xe9a   :  { %v902_v15 = vpop.permute.xlu0 %901  ;;  %v898_v17 = vmul.f32 %v1752_v14, %v1744_v3 }
 0xe9b   :  { %v1754_v16 = vpop.eup %1753  ;;  %1622 = vmatpush3.bf16.msra.mxu0 %v902_v15 }
 0xe9c   :  { %v899_v20 = vmul.f32 %v1754_v16, %v1746_v5  ;;  %1633 = vmatprep.subr.bf16.mxu0 %v1807_v11  ;;  %v1024_v22 = vpop.permute.xlu1 %1023 }
 0xe9e   :  { %v900_v21 = vpack.c.bf16 %v899_v20, %v898_v17  ;;  %v1715_v20 = vld [vmem:[%s2151_s3 + $0x40] sm:$0xff]  }
 0xea0   :  { %1624 = vmatmul.mubr.msk.bf16.vlgmr.msra.gmra.mrb[20].mxu0 %vm194_vm4, %v900_v21  ;;  %v1716_v21 = vld [vmem:[%s2151_s3 + $0x48] sm:$0xff]  }
 0xea1   :  { %v1756_v25 = vpop.eup %1755  ;;  %1634 = vmatpush3.bf16.msra.mxu0 %v1024_v22  ;;  %1635 = vmatprep.mubr.msk.bf16.mxu0 %vm1808_vm3, %v1807_v11  ;;  %v1481_v22 = vld [vmem:[%s2150_s2 + $0x4c] ss:$0 sm:$0xff] }
 0xea2   :  { %1645 = vmatprep.subr.bf16.mxu0 %v1807_v11  ;;  %v1020_v27 = vmul.f32 %v1756_v25, %v1748_v7 }
 0xea3   :  { %v1758_v26 = vpop.eup %1757 }
 0xea4   :  { %v1021_v28 = vmul.f32 %v1758_v26, %v1750_v9 }
 0xea6   :  { %v1022_v29 = vpack.c.bf16 %v1021_v28, %v1020_v27 }
 0xea8   :  { %1636 = vmatmul.mubr.msk.bf16.vlgmr.msra.gmra.mrb[24].mxu0 %vm194_vm4, %v1022_v29 }
 0xea9   :  { %1647 = vmatprep.mubr.msk.bf16.mxu0 %vm1808_vm3, %v1807_v11 }
 0xf73   :  { %v941_v30 = vpop.f32.mrb[20].mxu0 }
 0xf74   :  { %v1625_v31 = vpop.f32.mrb[21].mxu0 }
 0xf75   :  { %v944_v33 = vpop.f32.mrb[22].mxu0 }
 0xf76   :  { %v1626_v34 = vpop.f32.mrb[23].mxu0 }
 0xf77   :  { %v1484_v34 = vld [vmem:[%s2150_s2 + $0x4d] ss:$0 sm:$0xff] }
 0xf7b   :  { %v1063_v35 = vpop.f32.mrb[24].mxu0 }
 0xf7c   :  { %v1637_v36 = vpop.f32.mrb[25].mxu0 }
 0xf7d   :  { %v1066_v37 = vpop.f32.mrb[26].mxu0 }
 0xf7e   :  { %v1702_v38 = vpack.i.bf16 %v1066_v37, %v1063_v35  ;;  %v1638_v39 = vpop.f32.mrb[27].mxu0 }
 0xf80   :  { %1703 = vrot.lane.b32.xlu1 %v1702_v38, %s1815_s26 }
 0xff2   :  { %v1704_v40 = vpop.permute.xlu1 %1703 }
 0xff3   :  { %v1706_v41 = vunpack.i.h.bf16 %v1704_v40  ;;  %v1705_v42 = vunpack.i.l.bf16 %v1704_v40 }
 0xff5   :  { %v1079_v43 = vsel %vm246_vm5, %v944_v33, %v1706_v41  ;;  %v1078_v44 = vsel %vm246_vm5, %v941_v30, %v1705_v42 }
 0xff6   :  { %v1080_v45 = vpack.c.bf16 %v1079_v43, %v1078_v44 }
 0xff8   :  { %1642 = vmatmul.mubr.msk.bf16.vlgmr.msra.gmra.mrb[28].mxu1 %vm194_vm4, %v1080_v45 }
 0xff9   :  { %1655 = vmatprep.mubr.msk.bf16.mxu1 %vm1808_vm3, %v1807_v11  ;;  %1652 = vmatpush3.bf16.msra.mxu1 %v1715_v20 }
 0xffa   :  { %1653 = vmatprep.subr.bf16.mxu1 %v1807_v11 }
 0xffd   :  { %1654 = vmatpush3.bf16.msra.mxu1 %v1716_v21 }
0x10cb   :  { %v1131_v49 = vpop.f32.mrb[28].mxu1 }
0x10cc   :  { %v1132_v50 = vadd.f32 %v1476_v47, %v1131_v49  ;;  %v1643_v51 = vpop.f32.mrb[29].mxu1 }
0x10cd   :  { %v1134_v52 = vpop.f32.mrb[30].mxu1 }
0x10ce   :  { %v1135_v53 = vadd.f32 %v1476_v47, %v1134_v52  ;;  %v1644_v54 = vpop.f32.mrb[31].mxu1  ;;  %v1138_v55 = vadd.f32 %v1132_v50, %v2017_v18 }
0x10d0   :  { %v1142_v56 = vsel %vm194_vm4, %v1138_v55, 0.0  ;;  %v1139_v57 = vadd.f32 %v1135_v53, %v2019_v19  ;;  %v1714_v19 = vld [vmem:[%s2151_s3 + $0x28] sm:$0xff]  }
0x10d1   :  { %1143 = vadd.xlane.f32.xlu0 %v1142_v56  ;;  %1646 = vmatpush3.bf16.msra.mxu0 %v1714_v19  ;;  %v1489_v19 = vld [vmem:[%s2150_s2 + $0x4f] ss:$0 sm:$0xff] }
0x10d2   :  { %v1145_v58 = vsel %vm194_vm4, %v1139_v57, 0.0  ;;  %1659 = vmatprep.subr.bf16.mxu0 %v1807_v11 }
0x10d3   :  { %1146 = vadd.xlane.f32.xlu1 %v1145_v58 }
0x115e   :  { %v1144_v59 = vpop.xlane.xlu0 %1143 }
0x115f   :  { %v1148_v60 = vmul.f32 0.0625, %v1144_v59 }
0x1160   :  { %v1147_v61 = vpop.xlane.xlu1 %1146 }
0x1161   :  { %v1150_v62 = vsub.f32 %v1138_v55, %v1148_v60  ;;  %v1149_v46 = vmul.f32 0.0625, %v1147_v61 }
0x1163   :  { %v1151_v63 = vsub.f32 %v1139_v57, %v1149_v46  ;;  %v1152_v0 = vmul.f32 %v1150_v62, %v1150_v62  ;;  %v1717_v46 = vld [vmem:[%s2151_s3 + $0x50] sm:$0xff]  }
0x1165   :  { %v1154_v1 = vsel %vm194_vm4, %v1152_v0, 0.0  ;;  %v1153_v48 = vmul.f32 %v1151_v63, %v1151_v63  ;;  %v1488_v0 = vld [vmem:[%s2150_s2 + $0x4e] ss:$0 sm:$0xff]  ;;  %s1817_s2 = smov [#allocation5]  }
0x1166   :  { %1155 = vadd.xlane.f32.xlu0 %v1154_v1  ;;  %v1718_v1 = vld [vmem:[%s2151_s3 + $0x58] sm:$0xff]   ;;  %s1433_s3 = sshll.u32 %s1817_s2, 4  ;;  %s1434_s3 = int_to_ptr.vmem [resolvable:$true] %s1433_s3 }
0x1167   :  { %v1157_v18 = vsel %vm194_vm4, %v1153_v48, 0.0  ;;  %s1779_s28 = scalar_lea.vmem %s1434_s3, 32  ;;  %p1784_p6 = scmp.lt.s32.totalorder %s1434_s3, %s1434_s3 }
0x1168   :  { %p1780_p5 = scmp.ne.s32.totalorder %s1434_s3, %s1779_s28  ;;  %p1785_p7 = scmp.lt.s32.totalorder %s1779_s28, %s1779_s28 }
0x116a   :  { %1158 = vadd.xlane.f32.xlu0 %v1157_v18  ;;  %p1786_p8 = por %p1785_p7, %p1784_p6 }
0x116c   :  { %p1787_p9 = pnand %p1786_p8, %p1780_p5 }
0x11f3   :  { %v1156_v2 = vpop.xlane.xlu0 %1155 }
0x11f4   :  { %v1160_v3 = vmul.f32 0.0625, %v1156_v2 }
0x11f6   :  { %v1162_v4 = vadd.f32 1e-05, %v1160_v3 }
0x11f7   :  { %v1159_v5 = vpop.xlane.xlu0 %1158 }
0x11f8   :  { %1759 = vrsqrt.f32 %v1162_v4  ;;  %v1161_v6 = vmul.f32 0.0625, %v1159_v5 }
0x11fa   :  { %v1163_v7 = vadd.f32 1e-05, %v1161_v6 }
0x11fc   :  { %1761 = vrsqrt.f32 %v1163_v7 }
0x1202   :  { %v1760_v8 = vpop.eup %1759 }
0x1203   :  { %v1166_v9 = vmul.f32 %v1760_v8, %v1150_v62 }
0x1205   :  { %v1172_v13 = vmul.f32 %v1479_v10, %v1166_v9 }
0x1206   :  { %v1762_v12 = vpop.eup %1761 }
0x1207   :  { %v1167_v24 = vmul.f32 %v1762_v12, %v1151_v63  ;;  %v1178_v15 = vadd.f32 %v1480_v23, %v1172_v13 }
0x1209   :  { %v1173_v14 = vmul.f32 %v1479_v10, %v1167_v24 }
0x120b   :  { %v1179_v16 = vadd.f32 %v1480_v23, %v1173_v14 }
0x120d   :  { %v1180_v17 = vpack.c.bf16 %v1179_v16, %v1178_v15 }
0x120f   :  { %1648 = vmatmul.mubr.msk.bf16.vlgmr.msra.gmra.mrb[28].mxu0 %vm194_vm4, %v1180_v17 }
0x1210   :  { %1663 = vmatprep.mubr.msk.bf16.mxu0 %vm1808_vm3, %v1807_v11  ;;  %1660 = vmatpush3.bf16.msra.mxu0 %v1717_v46 }
0x1211   :  { %1661 = vmatprep.subr.bf16.mxu0 %v1807_v11 }
0x1214   :  { %1662 = vmatpush3.bf16.msra.mxu0 %v1718_v1 }
0x12e2   :  { %v1231_v25 = vpop.f32.mrb[28].mxu0 }
0x12e3   :  { %v1232_v26 = vadd.f32 %v1481_v22, %v1231_v25  ;;  %v1649_v27 = vpop.f32.mrb[29].mxu0 }
0x12e4   :  { %v1234_v28 = vpop.f32.mrb[30].mxu0 }
0x12e5   :  { %v1235_v29 = vadd.f32 %v1481_v22, %v1234_v28  ;;  %v1650_v30 = vpop.f32.mrb[31].mxu0  ;;  %v1238_v31 = vmax.f32 %v1232_v26, 0.0 }
0x12e7   :  { %v1239_v32 = vmax.f32 %v1235_v29, 0.0 }
0x12e9   :  { %v1240_v33 = vpack.c.bf16 %v1239_v32, %v1238_v31 }
0x12eb   :  { %1656 = vmatmul.mubr.msk.bf16.vlgmr.msra.gmra.mrb[32].mxu1 %vm679_vm14, %v1240_v33 }
0x13be   :  { %v1299_v35 = vpop.f32.mrb[32].mxu1 }
0x13bf   :  { %v1300_v36 = vadd.f32 %v1484_v34, %v1299_v35  ;;  %v1657_v37 = vpop.f32.mrb[33].mxu1 }
0x13c0   :  { %v1302_v38 = vpop.f32.mrb[34].mxu1 }
0x13c1   :  { %v1303_v39 = vadd.f32 %v1484_v34, %v1302_v38  ;;  %v1658_v40 = vpop.f32.mrb[35].mxu1  ;;  %v1306_v41 = vadd.f32 %v1300_v36, %v1178_v15 }
0x13c3   :  { %v1310_v42 = vsel %vm194_vm4, %v1306_v41, 0.0  ;;  %v1307_v43 = vadd.f32 %v1303_v39, %v1179_v16 }
0x13c4   :  { %1311 = vadd.xlane.f32.xlu0 %v1310_v42 }
0x13c5   :  { %v1313_v44 = vsel %vm194_vm4, %v1307_v43, 0.0 }
0x13c6   :  { %1314 = vadd.xlane.f32.xlu1 %v1313_v44 }
0x1451   :  { %v1312_v45 = vpop.xlane.xlu0 %1311 }
0x1452   :  { %v1316_v47 = vmul.f32 0.0625, %v1312_v45 }
0x1453   :  { %v1315_v49 = vpop.xlane.xlu1 %1314 }
0x1454   :  { %v1318_v50 = vsub.f32 %v1306_v41, %v1316_v47  ;;  %v1317_v51 = vmul.f32 0.0625, %v1315_v49 }
0x1456   :  { %v1319_v52 = vsub.f32 %v1307_v43, %v1317_v51  ;;  %v1320_v53 = vmul.f32 %v1318_v50, %v1318_v50 }
0x1458   :  { %v1322_v54 = vsel %vm194_vm4, %v1320_v53, 0.0  ;;  %v1321_v55 = vmul.f32 %v1319_v52, %v1319_v52 }
0x1459   :  { %1323 = vadd.xlane.f32.xlu0 %v1322_v54 }
0x145a   :  { %v1325_v56 = vsel %vm194_vm4, %v1321_v55, 0.0 }
0x145b   :  { %1326 = vadd.xlane.f32.xlu1 %v1325_v56 }
0x14e6   :  { %v1324_v57 = vpop.xlane.xlu0 %1323 }
0x14e7   :  { %v1328_v58 = vmul.f32 0.0625, %v1324_v57 }
0x14e8   :  { %v1327_v59 = vpop.xlane.xlu1 %1326 }
0x14e9   :  { %v1330_v60 = vadd.f32 1e-05, %v1328_v58  ;;  %v1329_v61 = vmul.f32 0.0625, %v1327_v59 }
0x14eb   :  { %1763 = vrsqrt.f32 %v1330_v60  ;;  %v1331_v62 = vadd.f32 1e-05, %v1329_v61 }
0x14ed   :  { %1765 = vrsqrt.f32 %v1331_v62 }
0x14f5   :  { %v1764_v63 = vpop.eup %1763 }
0x14f6   :  { %v1334_v48 = vmul.f32 %v1764_v63, %v1318_v50 }
0x14f7   :  { %v1766_v18 = vpop.eup %1765 }
0x14f8   :  { %v1340_v2 = vmul.f32 %v1488_v0, %v1334_v48  ;;  %v1335_v3 = vmul.f32 %v1766_v18, %v1319_v52 }
0x14fa   :  { %v1346_v4 = vadd.f32 %v1489_v19, %v1340_v2  ;;  %v1341_v11 = vmul.f32 %v1488_v0, %v1335_v3 }
0x14fc   :  { %v1349_v5 = vrot.slane %v1346_v4, 1  ;;  %v1347_v6 = vadd.f32 %v1489_v19, %v1341_v11 }
0x14fe   :  { %1350 = vrot.lane.b32.xlu0 %v1349_v5, %s1816_s27  ;;  %v1355_v7 = vrot.slane %v1347_v6, 1 }
0x1500   :  { %1356 = vrot.lane.b32.xlu1 %v1355_v7, %s1816_s27 }
0x1570   :  { %v1351_v8 = vpop.permute.xlu0 %1350 }
0x1571   :  { %v1353_v13 = vsel %vm194_vm4, %v1346_v4, %v1351_v8 }
0x1572   :  { %v1357_v9 = vpop.permute.xlu1 %1356 }
0x1573   :  { %v1359_v10 = vsel %vm194_vm4, %v1347_v6, %v1357_v9 }
0x1574   :  { %v1361_v12 = vrot.slane %v1359_v10, 7 }
0x1576   :  { %v1364_v24 = vsel %vm1363_vm15, %v1353_v13, %v1361_v12 }
0x1577   :  { %v1365_v23 = vpack.c.bf16 %v1364_v24, %v1364_v24 }
0x1579   :  { %1664 = vmatmul.mubr.msk.bf16.vlgmr.msra.gmra.mrb[32].mxu0 %vm679_vm14, %v1365_v23 }
0x164c   :  { %v1419_v14 = vpop.f32.mrb[32].mxu0 }
0x164d   :  { %v1665_v15 = vpop.f32.mrb[33].mxu0  ;;  %1426 = vst.msk [vmem:[#allocation5] sm:$0x3] %vm1425_vm0, %v1419_v14 }
0x164e   :  { %v1422_v16 = vpop.f32.mrb[34].mxu0 }
0x164f   :  { %1790 = shalt.err (!%p1787_p9)
}
0x1650   :  { %s1791_s18 = scalar_lea.hbm %s2152_s4, 32 }
0x1651   :  { %p1792_p10 = scmp.ne.s32.totalorder %s2152_s4, %s1791_s18  ;;  %p1795_p11 = scmp.lt.u32.totalorder %s1791_s18, %s2152_s4 }
0x1653   :  { %p1797_p12 = pnand %p1795_p11, %p1792_p10 }
0x1655   :  { %1800 = shalt.err (!%p1797_p12)
}
0x1656   :  { %1436 = dma.vmem_to_hbm [thread:$0]  %s1434_s3, 32, %s2152_s4, [#allocation3]   ;;  %v1666_v17 = vpop.f32.mrb[35].mxu0 }
0x1657   :  { %1803 = dma.done.wait [#allocation3], 32  }
0x1658   :  { %1804 = vsyncadd [#allocation3], 4294967264 }
0x1659   :  { %1440 = vsyncpa [#allocation3], 1 }
0x165a   :  { %1441 = vsyncpa [#allocation4], 1 }

</bundles_post_ra>
